<compile_context>
chip_gen: v6e
topology: v6e:2x2x1
jax: 0.10.0
libtpu: 0.0.40
codegen_flags: <defaults>
</compile_context>

<pallas_src>
import functools
import math

import jax
import jax.numpy as jnp
import numpy as np
from jax import lax
from jax.experimental import pallas as pl
from jax.experimental.pallas import tpu as pltpu

LANE = 128


def _masked_layernorm(z, gamma, beta, mask, inv_d, eps=1e-5):
    # z is exactly zero in padded lanes; gamma/beta are zero-padded, so the
    # output's padded lanes are exactly zero as well.  Statistics use only the
    # real D lanes (inv_d = 1/D, mask zeroes padded (z-mu) terms).
    mu = jnp.sum(z, axis=-1, keepdims=True) * inv_d
    d = (z - mu) * mask
    var = jnp.sum(d * d, axis=-1, keepdims=True) * inv_d
    return d * lax.rsqrt(var + eps) * gamma + beta


def encoder_layer_kernel(
    x_ref,                                                 # (N, Dp)  f32
    wq_ref, bq_ref, wk_ref, bk_ref, wv_ref, bv_ref,        # (h,Dp,dkp) bf16 / (h,1,dkp) f32
    wo_ref, bo_ref,                                        # (h,dkp,Dp) bf16 / (1,Dp) f32
    g1_ref, be1_ref,                                       # (1, Dp)  f32
    w1_ref, bf1_ref, w2_ref, bf2_ref,                      # (Dp,Fp)/(1,Fp)/(Fp,Dp)/(1,Dp)
    g2_ref, be2_ref,                                       # (1, Dp)  f32
    o_ref,                                                 # (N, Dp)
    *, B, S, D, h,
):
    N = B * S
    Dp = x_ref.shape[-1]
    dkp = wq_ref.shape[-1]

    x = x_ref[...]                            # f32 residual path (padded lanes = 0)
    x_bf = x.astype(jnp.bfloat16)             # bf16 MXU inputs

    inv_d = 1.0 / D
    lane = lax.broadcasted_iota(jnp.int32, (1, Dp), 1)
    mask = (lane < D).astype(jnp.float32)     # built once, shared by both LayerNorms

    # ---- multi-head attention: head-major weights, leading-axis ref indexing
    # only (no lane slicing), each head folded straight into the O-projection.
    mha = None
    for i in range(h):                        # static unroll; h is tiny
        q = jnp.dot(x_bf, wq_ref[i], preferred_element_type=jnp.float32) + bq_ref[i]
        k = jnp.dot(x_bf, wk_ref[i], preferred_element_type=jnp.float32) + bk_ref[i]
        v = jnp.dot(x_bf, wv_ref[i], preferred_element_type=jnp.float32) + bv_ref[i]
        qh = q.astype(jnp.bfloat16).reshape(B, S, dkp)
        kh = k.astype(jnp.bfloat16).reshape(B, S, dkp)
        vh = v.astype(jnp.bfloat16).reshape(B, S, dkp)
        # scores[b, s, t] = sum_d qh[b, s, d] * kh[b, t, d]   (1/sqrt(dk) folded into wq/bq)
        s = jnp.einsum("bsd,btd->bst", qh, kh, preferred_element_type=jnp.float32)
        s = s - jnp.max(s, axis=-1, keepdims=True)            # f32 softmax
        p = jnp.exp(s)
        p = p * pl.reciprocal(jnp.sum(p, axis=-1, keepdims=True), approx=True)
        ctx = jnp.einsum("bst,btd->bsd", p.astype(jnp.bfloat16), vh,
                         preferred_element_type=jnp.float32)   # (B, S, dkp)
        contrib = jnp.dot(ctx.reshape(N, dkp).astype(jnp.bfloat16), wo_ref[i],
                          preferred_element_type=jnp.float32)  # (N, Dp)
        mha = contrib if mha is None else mha + contrib        # head 0 initializes
    mha = mha + bo_ref[...]

    # ---- add & norm 1 (dropout == identity in eval mode) --------------------
    y = _masked_layernorm(mha + x, g1_ref[...], be1_ref[...], mask, inv_d)

    # ---- feed forward: Linear -> ReLU -> Linear (bf16 MXU, f32 elementwise) --
    ff = jnp.dot(y.astype(jnp.bfloat16), w1_ref[...],
                 preferred_element_type=jnp.float32) + bf1_ref[...]
    ff = jnp.maximum(ff, 0.0)
    ff = jnp.dot(ff.astype(jnp.bfloat16), w2_ref[...],
                 preferred_element_type=jnp.float32) + bf2_ref[...]

    # ---- add & norm 2 -------------------------------------------------------
    out = _masked_layernorm(ff + y, g2_ref[...], be2_ref[...], mask, inv_d)
    o_ref[...] = out.astype(o_ref.dtype)      # (N, Dp): lane-dense, unmasked vst


def encoder_layer(x, params, *, h):
    B, S, D = x.shape
    dk = D // h
    dff = params["w1"].shape[1]
    scale = 1.0 / math.sqrt(dk)
    bf16, f32 = jnp.bfloat16, jnp.float32

    N = B * S
    Dp = -(-D // LANE) * LANE
    Fp = -(-dff // LANE) * LANE
    dkp = -(-dk // LANE) * LANE

    def pad2(a, rows, cols):
        return jnp.pad(a, ((0, rows - a.shape[0]), (0, cols - a.shape[1])))

    def head_in_proj(w):          # (D, D) -> (h, Dp, dkp): columns of head i
        wh = w.reshape(D, h, dk).transpose(1, 0, 2)            # (h, D, dk)
        return jnp.pad(wh, ((0, 0), (0, Dp - D), (0, dkp - dk)))

    def head_bias(b):             # (1, D) -> (h, 1, dkp)
        bh = b.reshape(h, dk)[:, None, :]
        return jnp.pad(bh, ((0, 0), (0, 0), (0, dkp - dk)))

    # Scale folded into Q projection; matmul weights bf16 (MXU inputs); biases
    # and LayerNorm params stay f32 (v5e has no bf16 VPU/EUP).
    operands = [
        jnp.pad(x.reshape(N, D).astype(f32), ((0, 0), (0, Dp - D))),        # x
        head_in_proj(params["wq"] * scale).astype(bf16),
        head_bias(params["bq"] * scale).astype(f32),
        head_in_proj(params["wk"]).astype(bf16), head_bias(params["bk"]).astype(f32),
        head_in_proj(params["wv"]).astype(bf16), head_bias(params["bv"]).astype(f32),
        jnp.pad(params["wo"].reshape(h, dk, D),                              # (h, dkp, Dp)
                ((0, 0), (0, dkp - dk), (0, Dp - D))).astype(bf16),
        pad2(params["bo"], 1, Dp).astype(f32),
        pad2(params["g1"], 1, Dp).astype(f32), pad2(params["be1"], 1, Dp).astype(f32),
        pad2(params["w1"], Dp, Fp).astype(bf16), pad2(params["bf1"], 1, Fp).astype(f32),
        pad2(params["w2"], Fp, Dp).astype(bf16), pad2(params["bf2"], 1, Dp).astype(f32),
        pad2(params["g2"], 1, Dp).astype(f32), pad2(params["be2"], 1, Dp).astype(f32),
    ]

    flops = 8 * N * D * D + 4 * B * S * S * D + 4 * N * D * dff
    transcendentals = B * h * S * S + 4 * N
    operand_bytes = sum(int(np.prod(a.shape)) * a.dtype.itemsize for a in operands)
    out_bytes = N * Dp * x.dtype.itemsize
    bytes_accessed = operand_bytes + out_bytes

    # Right-sized scoped VMEM: double-buffered operands + output + slack
    # (~3 MiB here) instead of a blanket 32 MiB reservation.
    vmem_bytes = 2 * (operand_bytes + out_bytes) + (2 << 20)

    kernel = functools.partial(encoder_layer_kernel, B=B, S=S, D=D, h=h)

    # No grid: the whole padded problem (< 1 MiB) lives in VMEM for a single
    # invocation, so the ~0.35 us per-grid-step overhead is paid exactly once.
    out = pl.pallas_call(
        kernel,
        out_shape=jax.ShapeDtypeStruct((N, Dp), x.dtype),
        cost_estimate=pl.CostEstimate(
            flops=flops,
            transcendentals=transcendentals,
            bytes_accessed=bytes_accessed),
        compiler_params=pltpu.CompilerParams(
            vmem_limit_bytes=int(vmem_bytes)),
    )(*operands)

    # Padded lanes are exactly zero; drop them and un-flatten in the wrapper.
    return out[:, :D].reshape(B, S, D)


# ------------------------------ reference ----------------------------------
def encoder_layer_ref(x, params, *, h):
    B, S, D = x.shape
    dk = D // h
    x = x.astype(jnp.float32)

    def ln(z, g, b, eps=1e-5):
        mu = jnp.mean(z, axis=-1, keepdims=True)
        var = jnp.mean((z - mu) ** 2, axis=-1, keepdims=True)
        return (z - mu) / jnp.sqrt(var + eps) * g + b

    q = x @ params["wq"] + params["bq"]
    k = x @ params["wk"] + params["bk"]
    v = x @ params["wv"] + params["bv"]
    qh = q.reshape(B, S, h, dk).transpose(0, 2, 1, 3)
    kh = k.reshape(B, S, h, dk).transpose(0, 2, 1, 3)
    vh = v.reshape(B, S, h, dk).transpose(0, 2, 1, 3)
    scores = jnp.einsum("bhsd,bhtd->bhst", qh, kh) / jnp.sqrt(jnp.float32(dk))
    p = jax.nn.softmax(scores, axis=-1)
    attn = jnp.einsum("bhst,bhtd->bhsd", p, vh)
    concat = attn.transpose(0, 2, 1, 3).reshape(B, S, D)
    mha = concat @ params["wo"] + params["bo"]
    y = ln(mha + x, params["g1"], params["be1"])
    ff = jnp.maximum(y @ params["w1"] + params["bf1"], 0.0) @ params["w2"] + params["bf2"]
    return ln(ff + y, params["g2"], params["be2"])


# --------------------------------- main -------------------------------------
if __name__ == "__main__":
    # Small shapes consistent with the module: h=4 heads, d_model=32, d_ff=64.
    B, S, D, H, DFF = 2, 8, 32, 4, 64

    key = jax.random.PRNGKey(0)
    keys = jax.random.split(key, 16)

    def init(k, shape, scale=0.05):
        return (scale * jax.random.normal(k, shape)).astype(jnp.float32)

    params = {
        "wq": init(keys[0], (D, D)),   "bq": init(keys[1], (1, D)),
        "wk": init(keys[2], (D, D)),   "bk": init(keys[3], (1, D)),
        "wv": init(keys[4], (D, D)),   "bv": init(keys[5], (1, D)),
        "wo": init(keys[6], (D, D)),   "bo": init(keys[7], (1, D)),
        "g1": 1.0 + init(keys[8], (1, D)),  "be1": init(keys[9], (1, D)),
        "w1": init(keys[10], (D, DFF)), "bf1": init(keys[11], (1, DFF)),
        "w2": init(keys[12], (DFF, D)), "bf2": init(keys[13], (1, D)),
        "g2": 1.0 + init(keys[14], (1, D)), "be2": jnp.zeros((1, D), jnp.float32),
    }

    x = jax.random.normal(keys[15], (B, S, D), dtype=jnp.float32)

    out = jax.block_until_ready(encoder_layer(x, params, h=H))

    ref = encoder_layer_ref(x, params, h=H)
    # bf16 MXU inputs (f32 accumulation) + approx softmax reciprocal introduce
    # ~1e-3 abs error vs. the pure-f32 reference; 1e-2 leaves comfortable margin.
    np.testing.assert_allclose(np.asarray(out), np.asarray(ref), atol=1e-2, rtol=1e-2)

    print("KERNEL_OK")
</pallas_src>

<mosaic_0001>
module attributes {stable_mosaic.version = 11 : i64} {
  func.func @encoder_layer_kernel(%arg0: memref<16x128xf32, #tpu.memory_space<vmem>>, %arg1: memref<4x128x128xbf16, #tpu.memory_space<vmem>>, %arg2: memref<4x1x128xf32, #tpu.memory_space<vmem>>, %arg3: memref<4x128x128xbf16, #tpu.memory_space<vmem>>, %arg4: memref<4x1x128xf32, #tpu.memory_space<vmem>>, %arg5: memref<4x128x128xbf16, #tpu.memory_space<vmem>>, %arg6: memref<4x1x128xf32, #tpu.memory_space<vmem>>, %arg7: memref<4x128x128xbf16, #tpu.memory_space<vmem>>, %arg8: memref<1x128xf32, #tpu.memory_space<vmem>>, %arg9: memref<1x128xf32, #tpu.memory_space<vmem>>, %arg10: memref<1x128xf32, #tpu.memory_space<vmem>>, %arg11: memref<128x128xbf16, #tpu.memory_space<vmem>>, %arg12: memref<1x128xf32, #tpu.memory_space<vmem>>, %arg13: memref<128x128xbf16, #tpu.memory_space<vmem>>, %arg14: memref<1x128xf32, #tpu.memory_space<vmem>>, %arg15: memref<1x128xf32, #tpu.memory_space<vmem>>, %arg16: memref<1x128xf32, #tpu.memory_space<vmem>>, %arg17: memref<16x128xf32, #tpu.memory_space<vmem>>) attributes {dimension_semantics = [], scalar_prefetch = 0 : i64, scratch_operands = 0 : i64, tpu.core_type = #tpu.core_type<tc>} {
    %c0 = arith.constant 0 : index
    %c0_0 = arith.constant 0 : index
    %0 = vector.load %arg0[%c0, %c0_0] : memref<16x128xf32, #tpu.memory_space<vmem>>, vector<16x128xf32>
    %1 = arith.truncf %0 : vector<16x128xf32> to vector<16x128xbf16>
    %2 = tpu.iota {dimensions = array<i32: 1>} : vector<1x128xi32>
    %c32_i32 = arith.constant 32 : i32
    %3 = vector.broadcast %c32_i32 : i32 to vector<1x128xi32>
    %4 = arith.cmpi slt, %2, %3 : vector<1x128xi32>
    %5 = arith.extui %4 : vector<1x128xi1> to vector<1x128xi32>
    %6 = arith.sitofp %5 : vector<1x128xi32> to vector<1x128xf32>
    %c0_1 = arith.constant 0 : index
    %c0_2 = arith.constant 0 : index
    %c0_3 = arith.constant 0 : index
    %7 = vector.load %arg1[%c0_1, %c0_2, %c0_3] : memref<4x128x128xbf16, #tpu.memory_space<vmem>>, vector<1x128x128xbf16>
    %8 = vector.shape_cast %7 : vector<1x128x128xbf16> to vector<128x128xbf16>
    %cst = arith.constant dense<0.000000e+00> : vector<16x128xf32>
    %9 = tpu.matmul %1, %8, %cst {dimension_numbers = #tpu.dot_dimension_numbers<[1], [0], [0], [1], [0, 0, 1, 1], [], []>} : vector<16x128xbf16>, vector<128x128xbf16>, vector<16x128xf32> -> vector<16x128xf32>
    %c0_4 = arith.constant 0 : index
    %c0_5 = arith.constant 0 : index
    %c0_6 = arith.constant 0 : index
    %10 = vector.load %arg2[%c0_4, %c0_5, %c0_6] : memref<4x1x128xf32, #tpu.memory_space<vmem>>, vector<1x1x128xf32>
    %11 = vector.shape_cast %10 : vector<1x1x128xf32> to vector<1x128xf32>
    %12 = vector.broadcast %11 : vector<1x128xf32> to vector<16x128xf32>
    %13 = arith.addf %9, %12 : vector<16x128xf32>
    %c0_7 = arith.constant 0 : index
    %c0_8 = arith.constant 0 : index
    %c0_9 = arith.constant 0 : index
    %14 = vector.load %arg3[%c0_7, %c0_8, %c0_9] : memref<4x128x128xbf16, #tpu.memory_space<vmem>>, vector<1x128x128xbf16>
    %15 = vector.shape_cast %14 : vector<1x128x128xbf16> to vector<128x128xbf16>
    %cst_10 = arith.constant dense<0.000000e+00> : vector<16x128xf32>
    %16 = tpu.matmul %1, %15, %cst_10 {dimension_numbers = #tpu.dot_dimension_numbers<[1], [0], [0], [1], [0, 0, 1, 1], [], []>} : vector<16x128xbf16>, vector<128x128xbf16>, vector<16x128xf32> -> vector<16x128xf32>
    %c0_11 = arith.constant 0 : index
    %c0_12 = arith.constant 0 : index
    %c0_13 = arith.constant 0 : index
    %17 = vector.load %arg4[%c0_11, %c0_12, %c0_13] : memref<4x1x128xf32, #tpu.memory_space<vmem>>, vector<1x1x128xf32>
    %18 = vector.shape_cast %17 : vector<1x1x128xf32> to vector<1x128xf32>
    %19 = vector.broadcast %18 : vector<1x128xf32> to vector<16x128xf32>
    %20 = arith.addf %16, %19 : vector<16x128xf32>
    %c0_14 = arith.constant 0 : index
    %c0_15 = arith.constant 0 : index
    %c0_16 = arith.constant 0 : index
    %21 = vector.load %arg5[%c0_14, %c0_15, %c0_16] : memref<4x128x128xbf16, #tpu.memory_space<vmem>>, vector<1x128x128xbf16>
    %22 = vector.shape_cast %21 : vector<1x128x128xbf16> to vector<128x128xbf16>
    %cst_17 = arith.constant dense<0.000000e+00> : vector<16x128xf32>
    %23 = tpu.matmul %1, %22, %cst_17 {dimension_numbers = #tpu.dot_dimension_numbers<[1], [0], [0], [1], [0, 0, 1, 1], [], []>} : vector<16x128xbf16>, vector<128x128xbf16>, vector<16x128xf32> -> vector<16x128xf32>
    %c0_18 = arith.constant 0 : index
    %c0_19 = arith.constant 0 : index
    %c0_20 = arith.constant 0 : index
    %24 = vector.load %arg6[%c0_18, %c0_19, %c0_20] : memref<4x1x128xf32, #tpu.memory_space<vmem>>, vector<1x1x128xf32>
    %25 = vector.shape_cast %24 : vector<1x1x128xf32> to vector<1x128xf32>
    %26 = vector.broadcast %25 : vector<1x128xf32> to vector<16x128xf32>
    %27 = arith.addf %23, %26 : vector<16x128xf32>
    %28 = arith.truncf %13 : vector<16x128xf32> to vector<16x128xbf16>
    %29 = vector.shape_cast %28 : vector<16x128xbf16> to vector<2x8x128xbf16>
    %30 = arith.truncf %20 : vector<16x128xf32> to vector<16x128xbf16>
    %31 = vector.shape_cast %30 : vector<16x128xbf16> to vector<2x8x128xbf16>
    %32 = arith.truncf %27 : vector<16x128xf32> to vector<16x128xbf16>
    %33 = vector.shape_cast %32 : vector<16x128xbf16> to vector<2x8x128xbf16>
    "tpu.trace_start"() <{level = 10 : i32, message = "bsd,btd->bst"}> : () -> ()
    %cst_21 = arith.constant dense<0.000000e+00> : vector<2x8x8xf32>
    %34 = tpu.matmul %29, %31, %cst_21 {dimension_numbers = #tpu.dot_dimension_numbers<[2], [2], [1], [1], [0, 0, 0, 1, 1, 1], [0], [0]>} : vector<2x8x128xbf16>, vector<2x8x128xbf16>, vector<2x8x8xf32> -> vector<2x8x8xf32>
    "tpu.trace_stop"() : () -> ()
    %cst_22 = arith.constant dense<0xFF800000> : vector<2x8xf32>
    %35 = vector.multi_reduction <maximumf>, %34, %cst_22 [2] : vector<2x8x8xf32> to vector<2x8xf32>
    %36 = vector.shape_cast %35 : vector<2x8xf32> to vector<2x8x1xf32>
    %37 = vector.broadcast %36 : vector<2x8x1xf32> to vector<2x8x8xf32>
    %38 = arith.subf %34, %37 : vector<2x8x8xf32>
    %39 = math.exp %38 : vector<2x8x8xf32>
    %cst_23 = arith.constant dense<0.000000e+00> : vector<2x8xf32>
    %40 = vector.multi_reduction <add>, %39, %cst_23 [2] : vector<2x8x8xf32> to vector<2x8xf32>
    %41 = vector.shape_cast %40 : vector<2x8xf32> to vector<2x8x1xf32>
    %42 = tpu.reciprocal %41 {approx = true} : vector<2x8x1xf32> -> vector<2x8x1xf32>
    %43 = vector.broadcast %42 : vector<2x8x1xf32> to vector<2x8x8xf32>
    %44 = arith.mulf %39, %43 : vector<2x8x8xf32>
    %45 = arith.truncf %44 : vector<2x8x8xf32> to vector<2x8x8xbf16>
    "tpu.trace_start"() <{level = 10 : i32, message = "bst,btd->bsd"}> : () -> ()
    %cst_24 = arith.constant dense<0.000000e+00> : vector<2x8x128xf32>
    %46 = tpu.matmul %45, %33, %cst_24 {dimension_numbers = #tpu.dot_dimension_numbers<[2], [1], [1], [2], [0, 0, 0, 1, 1, 2], [0], [0]>} : vector<2x8x8xbf16>, vector<2x8x128xbf16>, vector<2x8x128xf32> -> vector<2x8x128xf32>
    "tpu.trace_stop"() : () -> ()
    %47 = vector.shape_cast %46 : vector<2x8x128xf32> to vector<16x128xf32>
    %48 = arith.truncf %47 : vector<16x128xf32> to vector<16x128xbf16>
    %c0_25 = arith.constant 0 : index
    %c0_26 = arith.constant 0 : index
    %c0_27 = arith.constant 0 : index
    %49 = vector.load %arg7[%c0_25, %c0_26, %c0_27] : memref<4x128x128xbf16, #tpu.memory_space<vmem>>, vector<1x128x128xbf16>
    %50 = vector.shape_cast %49 : vector<1x128x128xbf16> to vector<128x128xbf16>
    %cst_28 = arith.constant dense<0.000000e+00> : vector<16x128xf32>
    %51 = tpu.matmul %48, %50, %cst_28 {dimension_numbers = #tpu.dot_dimension_numbers<[1], [0], [0], [1], [0, 0, 1, 1], [], []>} : vector<16x128xbf16>, vector<128x128xbf16>, vector<16x128xf32> -> vector<16x128xf32>
    %c1 = arith.constant 1 : index
    %c0_29 = arith.constant 0 : index
    %c0_30 = arith.constant 0 : index
    %52 = vector.load %arg1[%c1, %c0_29, %c0_30] : memref<4x128x128xbf16, #tpu.memory_space<vmem>>, vector<1x128x128xbf16>
    %53 = vector.shape_cast %52 : vector<1x128x128xbf16> to vector<128x128xbf16>
    %cst_31 = arith.constant dense<0.000000e+00> : vector<16x128xf32>
    %54 = tpu.matmul %1, %53, %cst_31 {dimension_numbers = #tpu.dot_dimension_numbers<[1], [0], [0], [1], [0, 0, 1, 1], [], []>} : vector<16x128xbf16>, vector<128x128xbf16>, vector<16x128xf32> -> vector<16x128xf32>
    %c1_32 = arith.constant 1 : index
    %c0_33 = arith.constant 0 : index
    %c0_34 = arith.constant 0 : index
    %55 = vector.load %arg2[%c1_32, %c0_33, %c0_34] : memref<4x1x128xf32, #tpu.memory_space<vmem>>, vector<1x1x128xf32>
    %56 = vector.shape_cast %55 : vector<1x1x128xf32> to vector<1x128xf32>
    %57 = vector.broadcast %56 : vector<1x128xf32> to vector<16x128xf32>
    %58 = arith.addf %54, %57 : vector<16x128xf32>
    %c1_35 = arith.constant 1 : index
    %c0_36 = arith.constant 0 : index
    %c0_37 = arith.constant 0 : index
    %59 = vector.load %arg3[%c1_35, %c0_36, %c0_37] : memref<4x128x128xbf16, #tpu.memory_space<vmem>>, vector<1x128x128xbf16>
    %60 = vector.shape_cast %59 : vector<1x128x128xbf16> to vector<128x128xbf16>
    %cst_38 = arith.constant dense<0.000000e+00> : vector<16x128xf32>
    %61 = tpu.matmul %1, %60, %cst_38 {dimension_numbers = #tpu.dot_dimension_numbers<[1], [0], [0], [1], [0, 0, 1, 1], [], []>} : vector<16x128xbf16>, vector<128x128xbf16>, vector<16x128xf32> -> vector<16x128xf32>
    %c1_39 = arith.constant 1 : index
    %c0_40 = arith.constant 0 : index
    %c0_41 = arith.constant 0 : index
    %62 = vector.load %arg4[%c1_39, %c0_40, %c0_41] : memref<4x1x128xf32, #tpu.memory_space<vmem>>, vector<1x1x128xf32>
    %63 = vector.shape_cast %62 : vector<1x1x128xf32> to vector<1x128xf32>
    %64 = vector.broadcast %63 : vector<1x128xf32> to vector<16x128xf32>
    %65 = arith.addf %61, %64 : vector<16x128xf32>
    %c1_42 = arith.constant 1 : index
    %c0_43 = arith.constant 0 : index
    %c0_44 = arith.constant 0 : index
    %66 = vector.load %arg5[%c1_42, %c0_43, %c0_44] : memref<4x128x128xbf16, #tpu.memory_space<vmem>>, vector<1x128x128xbf16>
    %67 = vector.shape_cast %66 : vector<1x128x128xbf16> to vector<128x128xbf16>
    %cst_45 = arith.constant dense<0.000000e+00> : vector<16x128xf32>
    %68 = tpu.matmul %1, %67, %cst_45 {dimension_numbers = #tpu.dot_dimension_numbers<[1], [0], [0], [1], [0, 0, 1, 1], [], []>} : vector<16x128xbf16>, vector<128x128xbf16>, vector<16x128xf32> -> vector<16x128xf32>
    %c1_46 = arith.constant 1 : index
    %c0_47 = arith.constant 0 : index
    %c0_48 = arith.constant 0 : index
    %69 = vector.load %arg6[%c1_46, %c0_47, %c0_48] : memref<4x1x128xf32, #tpu.memory_space<vmem>>, vector<1x1x128xf32>
    %70 = vector.shape_cast %69 : vector<1x1x128xf32> to vector<1x128xf32>
    %71 = vector.broadcast %70 : vector<1x128xf32> to vector<16x128xf32>
    %72 = arith.addf %68, %71 : vector<16x128xf32>
    %73 = arith.truncf %58 : vector<16x128xf32> to vector<16x128xbf16>
    %74 = vector.shape_cast %73 : vector<16x128xbf16> to vector<2x8x128xbf16>
    %75 = arith.truncf %65 : vector<16x128xf32> to vector<16x128xbf16>
    %76 = vector.shape_cast %75 : vector<16x128xbf16> to vector<2x8x128xbf16>
    %77 = arith.truncf %72 : vector<16x128xf32> to vector<16x128xbf16>
    %78 = vector.shape_cast %77 : vector<16x128xbf16> to vector<2x8x128xbf16>
    "tpu.trace_start"() <{level = 10 : i32, message = "bsd,btd->bst"}> : () -> ()
    %cst_49 = arith.constant dense<0.000000e+00> : vector<2x8x8xf32>
    %79 = tpu.matmul %74, %76, %cst_49 {dimension_numbers = #tpu.dot_dimension_numbers<[2], [2], [1], [1], [0, 0, 0, 1, 1, 1], [0], [0]>} : vector<2x8x128xbf16>, vector<2x8x128xbf16>, vector<2x8x8xf32> -> vector<2x8x8xf32>
    "tpu.trace_stop"() : () -> ()
    %cst_50 = arith.constant dense<0xFF800000> : vector<2x8xf32>
    %80 = vector.multi_reduction <maximumf>, %79, %cst_50 [2] : vector<2x8x8xf32> to vector<2x8xf32>
    %81 = vector.shape_cast %80 : vector<2x8xf32> to vector<2x8x1xf32>
    %82 = vector.broadcast %81 : vector<2x8x1xf32> to vector<2x8x8xf32>
    %83 = arith.subf %79, %82 : vector<2x8x8xf32>
    %84 = math.exp %83 : vector<2x8x8xf32>
    %cst_51 = arith.constant dense<0.000000e+00> : vector<2x8xf32>
    %85 = vector.multi_reduction <add>, %84, %cst_51 [2] : vector<2x8x8xf32> to vector<2x8xf32>
    %86 = vector.shape_cast %85 : vector<2x8xf32> to vector<2x8x1xf32>
    %87 = tpu.reciprocal %86 {approx = true} : vector<2x8x1xf32> -> vector<2x8x1xf32>
    %88 = vector.broadcast %87 : vector<2x8x1xf32> to vector<2x8x8xf32>
    %89 = arith.mulf %84, %88 : vector<2x8x8xf32>
    %90 = arith.truncf %89 : vector<2x8x8xf32> to vector<2x8x8xbf16>
    "tpu.trace_start"() <{level = 10 : i32, message = "bst,btd->bsd"}> : () -> ()
    %cst_52 = arith.constant dense<0.000000e+00> : vector<2x8x128xf32>
    %91 = tpu.matmul %90, %78, %cst_52 {dimension_numbers = #tpu.dot_dimension_numbers<[2], [1], [1], [2], [0, 0, 0, 1, 1, 2], [0], [0]>} : vector<2x8x8xbf16>, vector<2x8x128xbf16>, vector<2x8x128xf32> -> vector<2x8x128xf32>
    "tpu.trace_stop"() : () -> ()
    %92 = vector.shape_cast %91 : vector<2x8x128xf32> to vector<16x128xf32>
    %93 = arith.truncf %92 : vector<16x128xf32> to vector<16x128xbf16>
    %c1_53 = arith.constant 1 : index
    %c0_54 = arith.constant 0 : index
    %c0_55 = arith.constant 0 : index
    %94 = vector.load %arg7[%c1_53, %c0_54, %c0_55] : memref<4x128x128xbf16, #tpu.memory_space<vmem>>, vector<1x128x128xbf16>
    %95 = vector.shape_cast %94 : vector<1x128x128xbf16> to vector<128x128xbf16>
    %cst_56 = arith.constant dense<0.000000e+00> : vector<16x128xf32>
    %96 = tpu.matmul %93, %95, %cst_56 {dimension_numbers = #tpu.dot_dimension_numbers<[1], [0], [0], [1], [0, 0, 1, 1], [], []>} : vector<16x128xbf16>, vector<128x128xbf16>, vector<16x128xf32> -> vector<16x128xf32>
    %97 = arith.addf %51, %96 : vector<16x128xf32>
    %c2 = arith.constant 2 : index
    %c0_57 = arith.constant 0 : index
    %c0_58 = arith.constant 0 : index
    %98 = vector.load %arg1[%c2, %c0_57, %c0_58] : memref<4x128x128xbf16, #tpu.memory_space<vmem>>, vector<1x128x128xbf16>
    %99 = vector.shape_cast %98 : vector<1x128x128xbf16> to vector<128x128xbf16>
    %cst_59 = arith.constant dense<0.000000e+00> : vector<16x128xf32>
    %100 = tpu.matmul %1, %99, %cst_59 {dimension_numbers = #tpu.dot_dimension_numbers<[1], [0], [0], [1], [0, 0, 1, 1], [], []>} : vector<16x128xbf16>, vector<128x128xbf16>, vector<16x128xf32> -> vector<16x128xf32>
    %c2_60 = arith.constant 2 : index
    %c0_61 = arith.constant 0 : index
    %c0_62 = arith.constant 0 : index
    %101 = vector.load %arg2[%c2_60, %c0_61, %c0_62] : memref<4x1x128xf32, #tpu.memory_space<vmem>>, vector<1x1x128xf32>
    %102 = vector.shape_cast %101 : vector<1x1x128xf32> to vector<1x128xf32>
    %103 = vector.broadcast %102 : vector<1x128xf32> to vector<16x128xf32>
    %104 = arith.addf %100, %103 : vector<16x128xf32>
    %c2_63 = arith.constant 2 : index
    %c0_64 = arith.constant 0 : index
    %c0_65 = arith.constant 0 : index
    %105 = vector.load %arg3[%c2_63, %c0_64, %c0_65] : memref<4x128x128xbf16, #tpu.memory_space<vmem>>, vector<1x128x128xbf16>
    %106 = vector.shape_cast %105 : vector<1x128x128xbf16> to vector<128x128xbf16>
    %cst_66 = arith.constant dense<0.000000e+00> : vector<16x128xf32>
    %107 = tpu.matmul %1, %106, %cst_66 {dimension_numbers = #tpu.dot_dimension_numbers<[1], [0], [0], [1], [0, 0, 1, 1], [], []>} : vector<16x128xbf16>, vector<128x128xbf16>, vector<16x128xf32> -> vector<16x128xf32>
    %c2_67 = arith.constant 2 : index
    %c0_68 = arith.constant 0 : index
    %c0_69 = arith.constant 0 : index
    %108 = vector.load %arg4[%c2_67, %c0_68, %c0_69] : memref<4x1x128xf32, #tpu.memory_space<vmem>>, vector<1x1x128xf32>
    %109 = vector.shape_cast %108 : vector<1x1x128xf32> to vector<1x128xf32>
    %110 = vector.broadcast %109 : vector<1x128xf32> to vector<16x128xf32>
    %111 = arith.addf %107, %110 : vector<16x128xf32>
    %c2_70 = arith.constant 2 : index
    %c0_71 = arith.constant 0 : index
    %c0_72 = arith.constant 0 : index
    %112 = vector.load %arg5[%c2_70, %c0_71, %c0_72] : memref<4x128x128xbf16, #tpu.memory_space<vmem>>, vector<1x128x128xbf16>
    %113 = vector.shape_cast %112 : vector<1x128x128xbf16> to vector<128x128xbf16>
    %cst_73 = arith.constant dense<0.000000e+00> : vector<16x128xf32>
    %114 = tpu.matmul %1, %113, %cst_73 {dimension_numbers = #tpu.dot_dimension_numbers<[1], [0], [0], [1], [0, 0, 1, 1], [], []>} : vector<16x128xbf16>, vector<128x128xbf16>, vector<16x128xf32> -> vector<16x128xf32>
    %c2_74 = arith.constant 2 : index
    %c0_75 = arith.constant 0 : index
    %c0_76 = arith.constant 0 : index
    %115 = vector.load %arg6[%c2_74, %c0_75, %c0_76] : memref<4x1x128xf32, #tpu.memory_space<vmem>>, vector<1x1x128xf32>
    %116 = vector.shape_cast %115 : vector<1x1x128xf32> to vector<1x128xf32>
    %117 = vector.broadcast %116 : vector<1x128xf32> to vector<16x128xf32>
    %118 = arith.addf %114, %117 : vector<16x128xf32>
    %119 = arith.truncf %104 : vector<16x128xf32> to vector<16x128xbf16>
    %120 = vector.shape_cast %119 : vector<16x128xbf16> to vector<2x8x128xbf16>
    %121 = arith.truncf %111 : vector<16x128xf32> to vector<16x128xbf16>
    %122 = vector.shape_cast %121 : vector<16x128xbf16> to vector<2x8x128xbf16>
    %123 = arith.truncf %118 : vector<16x128xf32> to vector<16x128xbf16>
    %124 = vector.shape_cast %123 : vector<16x128xbf16> to vector<2x8x128xbf16>
    "tpu.trace_start"() <{level = 10 : i32, message = "bsd,btd->bst"}> : () -> ()
    %cst_77 = arith.constant dense<0.000000e+00> : vector<2x8x8xf32>
    %125 = tpu.matmul %120, %122, %cst_77 {dimension_numbers = #tpu.dot_dimension_numbers<[2], [2], [1], [1], [0, 0, 0, 1, 1, 1], [0], [0]>} : vector<2x8x128xbf16>, vector<2x8x128xbf16>, vector<2x8x8xf32> -> vector<2x8x8xf32>
    "tpu.trace_stop"() : () -> ()
    %cst_78 = arith.constant dense<0xFF800000> : vector<2x8xf32>
    %126 = vector.multi_reduction <maximumf>, %125, %cst_78 [2] : vector<2x8x8xf32> to vector<2x8xf32>
    %127 = vector.shape_cast %126 : vector<2x8xf32> to vector<2x8x1xf32>
    %128 = vector.broadcast %127 : vector<2x8x1xf32> to vector<2x8x8xf32>
    %129 = arith.subf %125, %128 : vector<2x8x8xf32>
    %130 = math.exp %129 : vector<2x8x8xf32>
    %cst_79 = arith.constant dense<0.000000e+00> : vector<2x8xf32>
    %131 = vector.multi_reduction <add>, %130, %cst_79 [2] : vector<2x8x8xf32> to vector<2x8xf32>
    %132 = vector.shape_cast %131 : vector<2x8xf32> to vector<2x8x1xf32>
    %133 = tpu.reciprocal %132 {approx = true} : vector<2x8x1xf32> -> vector<2x8x1xf32>
    %134 = vector.broadcast %133 : vector<2x8x1xf32> to vector<2x8x8xf32>
    %135 = arith.mulf %130, %134 : vector<2x8x8xf32>
    %136 = arith.truncf %135 : vector<2x8x8xf32> to vector<2x8x8xbf16>
    "tpu.trace_start"() <{level = 10 : i32, message = "bst,btd->bsd"}> : () -> ()
    %cst_80 = arith.constant dense<0.000000e+00> : vector<2x8x128xf32>
    %137 = tpu.matmul %136, %124, %cst_80 {dimension_numbers = #tpu.dot_dimension_numbers<[2], [1], [1], [2], [0, 0, 0, 1, 1, 2], [0], [0]>} : vector<2x8x8xbf16>, vector<2x8x128xbf16>, vector<2x8x128xf32> -> vector<2x8x128xf32>
    "tpu.trace_stop"() : () -> ()
    %138 = vector.shape_cast %137 : vector<2x8x128xf32> to vector<16x128xf32>
    %139 = arith.truncf %138 : vector<16x128xf32> to vector<16x128xbf16>
    %c2_81 = arith.constant 2 : index
    %c0_82 = arith.constant 0 : index
    %c0_83 = arith.constant 0 : index
    %140 = vector.load %arg7[%c2_81, %c0_82, %c0_83] : memref<4x128x128xbf16, #tpu.memory_space<vmem>>, vector<1x128x128xbf16>
    %141 = vector.shape_cast %140 : vector<1x128x128xbf16> to vector<128x128xbf16>
    %cst_84 = arith.constant dense<0.000000e+00> : vector<16x128xf32>
    %142 = tpu.matmul %139, %141, %cst_84 {dimension_numbers = #tpu.dot_dimension_numbers<[1], [0], [0], [1], [0, 0, 1, 1], [], []>} : vector<16x128xbf16>, vector<128x128xbf16>, vector<16x128xf32> -> vector<16x128xf32>
    %143 = arith.addf %97, %142 : vector<16x128xf32>
    %c3 = arith.constant 3 : index
    %c0_85 = arith.constant 0 : index
    %c0_86 = arith.constant 0 : index
    %144 = vector.load %arg1[%c3, %c0_85, %c0_86] : memref<4x128x128xbf16, #tpu.memory_space<vmem>>, vector<1x128x128xbf16>
    %145 = vector.shape_cast %144 : vector<1x128x128xbf16> to vector<128x128xbf16>
    %cst_87 = arith.constant dense<0.000000e+00> : vector<16x128xf32>
    %146 = tpu.matmul %1, %145, %cst_87 {dimension_numbers = #tpu.dot_dimension_numbers<[1], [0], [0], [1], [0, 0, 1, 1], [], []>} : vector<16x128xbf16>, vector<128x128xbf16>, vector<16x128xf32> -> vector<16x128xf32>
    %c3_88 = arith.constant 3 : index
    %c0_89 = arith.constant 0 : index
    %c0_90 = arith.constant 0 : index
    %147 = vector.load %arg2[%c3_88, %c0_89, %c0_90] : memref<4x1x128xf32, #tpu.memory_space<vmem>>, vector<1x1x128xf32>
    %148 = vector.shape_cast %147 : vector<1x1x128xf32> to vector<1x128xf32>
    %149 = vector.broadcast %148 : vector<1x128xf32> to vector<16x128xf32>
    %150 = arith.addf %146, %149 : vector<16x128xf32>
    %c3_91 = arith.constant 3 : index
    %c0_92 = arith.constant 0 : index
    %c0_93 = arith.constant 0 : index
    %151 = vector.load %arg3[%c3_91, %c0_92, %c0_93] : memref<4x128x128xbf16, #tpu.memory_space<vmem>>, vector<1x128x128xbf16>
    %152 = vector.shape_cast %151 : vector<1x128x128xbf16> to vector<128x128xbf16>
    %cst_94 = arith.constant dense<0.000000e+00> : vector<16x128xf32>
    %153 = tpu.matmul %1, %152, %cst_94 {dimension_numbers = #tpu.dot_dimension_numbers<[1], [0], [0], [1], [0, 0, 1, 1], [], []>} : vector<16x128xbf16>, vector<128x128xbf16>, vector<16x128xf32> -> vector<16x128xf32>
    %c3_95 = arith.constant 3 : index
    %c0_96 = arith.constant 0 : index
    %c0_97 = arith.constant 0 : index
    %154 = vector.load %arg4[%c3_95, %c0_96, %c0_97] : memref<4x1x128xf32, #tpu.memory_space<vmem>>, vector<1x1x128xf32>
    %155 = vector.shape_cast %154 : vector<1x1x128xf32> to vector<1x128xf32>
    %156 = vector.broadcast %155 : vector<1x128xf32> to vector<16x128xf32>
    %157 = arith.addf %153, %156 : vector<16x128xf32>
    %c3_98 = arith.constant 3 : index
    %c0_99 = arith.constant 0 : index
    %c0_100 = arith.constant 0 : index
    %158 = vector.load %arg5[%c3_98, %c0_99, %c0_100] : memref<4x128x128xbf16, #tpu.memory_space<vmem>>, vector<1x128x128xbf16>
    %159 = vector.shape_cast %158 : vector<1x128x128xbf16> to vector<128x128xbf16>
    %cst_101 = arith.constant dense<0.000000e+00> : vector<16x128xf32>
    %160 = tpu.matmul %1, %159, %cst_101 {dimension_numbers = #tpu.dot_dimension_numbers<[1], [0], [0], [1], [0, 0, 1, 1], [], []>} : vector<16x128xbf16>, vector<128x128xbf16>, vector<16x128xf32> -> vector<16x128xf32>
    %c3_102 = arith.constant 3 : index
    %c0_103 = arith.constant 0 : index
    %c0_104 = arith.constant 0 : index
    %161 = vector.load %arg6[%c3_102, %c0_103, %c0_104] : memref<4x1x128xf32, #tpu.memory_space<vmem>>, vector<1x1x128xf32>
    %162 = vector.shape_cast %161 : vector<1x1x128xf32> to vector<1x128xf32>
    %163 = vector.broadcast %162 : vector<1x128xf32> to vector<16x128xf32>
    %164 = arith.addf %160, %163 : vector<16x128xf32>
    %165 = arith.truncf %150 : vector<16x128xf32> to vector<16x128xbf16>
    %166 = vector.shape_cast %165 : vector<16x128xbf16> to vector<2x8x128xbf16>
    %167 = arith.truncf %157 : vector<16x128xf32> to vector<16x128xbf16>
    %168 = vector.shape_cast %167 : vector<16x128xbf16> to vector<2x8x128xbf16>
    %169 = arith.truncf %164 : vector<16x128xf32> to vector<16x128xbf16>
    %170 = vector.shape_cast %169 : vector<16x128xbf16> to vector<2x8x128xbf16>
    "tpu.trace_start"() <{level = 10 : i32, message = "bsd,btd->bst"}> : () -> ()
    %cst_105 = arith.constant dense<0.000000e+00> : vector<2x8x8xf32>
    %171 = tpu.matmul %166, %168, %cst_105 {dimension_numbers = #tpu.dot_dimension_numbers<[2], [2], [1], [1], [0, 0, 0, 1, 1, 1], [0], [0]>} : vector<2x8x128xbf16>, vector<2x8x128xbf16>, vector<2x8x8xf32> -> vector<2x8x8xf32>
    "tpu.trace_stop"() : () -> ()
    %cst_106 = arith.constant dense<0xFF800000> : vector<2x8xf32>
    %172 = vector.multi_reduction <maximumf>, %171, %cst_106 [2] : vector<2x8x8xf32> to vector<2x8xf32>
    %173 = vector.shape_cast %172 : vector<2x8xf32> to vector<2x8x1xf32>
    %174 = vector.broadcast %173 : vector<2x8x1xf32> to vector<2x8x8xf32>
    %175 = arith.subf %171, %174 : vector<2x8x8xf32>
    %176 = math.exp %175 : vector<2x8x8xf32>
    %cst_107 = arith.constant dense<0.000000e+00> : vector<2x8xf32>
    %177 = vector.multi_reduction <add>, %176, %cst_107 [2] : vector<2x8x8xf32> to vector<2x8xf32>
    %178 = vector.shape_cast %177 : vector<2x8xf32> to vector<2x8x1xf32>
    %179 = tpu.reciprocal %178 {approx = true} : vector<2x8x1xf32> -> vector<2x8x1xf32>
    %180 = vector.broadcast %179 : vector<2x8x1xf32> to vector<2x8x8xf32>
    %181 = arith.mulf %176, %180 : vector<2x8x8xf32>
    %182 = arith.truncf %181 : vector<2x8x8xf32> to vector<2x8x8xbf16>
    "tpu.trace_start"() <{level = 10 : i32, message = "bst,btd->bsd"}> : () -> ()
    %cst_108 = arith.constant dense<0.000000e+00> : vector<2x8x128xf32>
    %183 = tpu.matmul %182, %170, %cst_108 {dimension_numbers = #tpu.dot_dimension_numbers<[2], [1], [1], [2], [0, 0, 0, 1, 1, 2], [0], [0]>} : vector<2x8x8xbf16>, vector<2x8x128xbf16>, vector<2x8x128xf32> -> vector<2x8x128xf32>
    "tpu.trace_stop"() : () -> ()
    %184 = vector.shape_cast %183 : vector<2x8x128xf32> to vector<16x128xf32>
    %185 = arith.truncf %184 : vector<16x128xf32> to vector<16x128xbf16>
    %c3_109 = arith.constant 3 : index
    %c0_110 = arith.constant 0 : index
    %c0_111 = arith.constant 0 : index
    %186 = vector.load %arg7[%c3_109, %c0_110, %c0_111] : memref<4x128x128xbf16, #tpu.memory_space<vmem>>, vector<1x128x128xbf16>
    %187 = vector.shape_cast %186 : vector<1x128x128xbf16> to vector<128x128xbf16>
    %cst_112 = arith.constant dense<0.000000e+00> : vector<16x128xf32>
    %188 = tpu.matmul %185, %187, %cst_112 {dimension_numbers = #tpu.dot_dimension_numbers<[1], [0], [0], [1], [0, 0, 1, 1], [], []>} : vector<16x128xbf16>, vector<128x128xbf16>, vector<16x128xf32> -> vector<16x128xf32>
    %189 = arith.addf %143, %188 : vector<16x128xf32>
    %c0_113 = arith.constant 0 : index
    %c0_114 = arith.constant 0 : index
    %190 = vector.load %arg8[%c0_113, %c0_114] : memref<1x128xf32, #tpu.memory_space<vmem>>, vector<1x128xf32>
    %191 = vector.broadcast %190 : vector<1x128xf32> to vector<16x128xf32>
    %192 = arith.addf %189, %191 : vector<16x128xf32>
    %193 = arith.addf %192, %0 : vector<16x128xf32>
    %c0_115 = arith.constant 0 : index
    %c0_116 = arith.constant 0 : index
    %194 = vector.load %arg9[%c0_115, %c0_116] : memref<1x128xf32, #tpu.memory_space<vmem>>, vector<1x128xf32>
    %c0_117 = arith.constant 0 : index
    %c0_118 = arith.constant 0 : index
    %195 = vector.load %arg10[%c0_117, %c0_118] : memref<1x128xf32, #tpu.memory_space<vmem>>, vector<1x128xf32>
    %cst_119 = arith.constant dense<0.000000e+00> : vector<16xf32>
    %196 = vector.multi_reduction <add>, %193, %cst_119 [1] : vector<16x128xf32> to vector<16xf32>
    %197 = vector.shape_cast %196 : vector<16xf32> to vector<16x1xf32>
    %cst_120 = arith.constant 3.125000e-02 : f32
    %198 = vector.broadcast %cst_120 : f32 to vector<16x1xf32>
    %199 = arith.mulf %197, %198 : vector<16x1xf32>
    %200 = vector.broadcast %199 : vector<16x1xf32> to vector<16x128xf32>
    %201 = arith.subf %193, %200 : vector<16x128xf32>
    %202 = vector.broadcast %6 : vector<1x128xf32> to vector<16x128xf32>
    %203 = arith.mulf %201, %202 : vector<16x128xf32>
    %204 = arith.mulf %203, %203 : vector<16x128xf32>
    %cst_121 = arith.constant dense<0.000000e+00> : vector<16xf32>
    %205 = vector.multi_reduction <add>, %204, %cst_121 [1] : vector<16x128xf32> to vector<16xf32>
    %206 = vector.shape_cast %205 : vector<16xf32> to vector<16x1xf32>
    %cst_122 = arith.constant 3.125000e-02 : f32
    %207 = vector.broadcast %cst_122 : f32 to vector<16x1xf32>
    %208 = arith.mulf %206, %207 : vector<16x1xf32>
    %cst_123 = arith.constant 9.99999974E-6 : f32
    %209 = vector.broadcast %cst_123 : f32 to vector<16x1xf32>
    %210 = arith.addf %208, %209 : vector<16x1xf32>
    %211 = math.rsqrt %210 : vector<16x1xf32>
    %212 = vector.broadcast %211 : vector<16x1xf32> to vector<16x128xf32>
    %213 = arith.mulf %203, %212 : vector<16x128xf32>
    %214 = vector.broadcast %194 : vector<1x128xf32> to vector<16x128xf32>
    %215 = arith.mulf %213, %214 : vector<16x128xf32>
    %216 = vector.broadcast %195 : vector<1x128xf32> to vector<16x128xf32>
    %217 = arith.addf %215, %216 : vector<16x128xf32>
    %218 = arith.truncf %217 : vector<16x128xf32> to vector<16x128xbf16>
    %c0_124 = arith.constant 0 : index
    %c0_125 = arith.constant 0 : index
    %219 = vector.load %arg11[%c0_124, %c0_125] : memref<128x128xbf16, #tpu.memory_space<vmem>>, vector<128x128xbf16>
    %cst_126 = arith.constant dense<0.000000e+00> : vector<16x128xf32>
    %220 = tpu.matmul %218, %219, %cst_126 {dimension_numbers = #tpu.dot_dimension_numbers<[1], [0], [0], [1], [0, 0, 1, 1], [], []>} : vector<16x128xbf16>, vector<128x128xbf16>, vector<16x128xf32> -> vector<16x128xf32>
    %c0_127 = arith.constant 0 : index
    %c0_128 = arith.constant 0 : index
    %221 = vector.load %arg12[%c0_127, %c0_128] : memref<1x128xf32, #tpu.memory_space<vmem>>, vector<1x128xf32>
    %222 = vector.broadcast %221 : vector<1x128xf32> to vector<16x128xf32>
    %223 = arith.addf %220, %222 : vector<16x128xf32>
    %cst_129 = arith.constant 0.000000e+00 : f32
    %224 = vector.broadcast %cst_129 : f32 to vector<16x128xf32>
    %225 = arith.maximumf %223, %224 : vector<16x128xf32>
    %226 = arith.truncf %225 : vector<16x128xf32> to vector<16x128xbf16>
    %c0_130 = arith.constant 0 : index
    %c0_131 = arith.constant 0 : index
    %227 = vector.load %arg13[%c0_130, %c0_131] : memref<128x128xbf16, #tpu.memory_space<vmem>>, vector<128x128xbf16>
    %cst_132 = arith.constant dense<0.000000e+00> : vector<16x128xf32>
    %228 = tpu.matmul %226, %227, %cst_132 {dimension_numbers = #tpu.dot_dimension_numbers<[1], [0], [0], [1], [0, 0, 1, 1], [], []>} : vector<16x128xbf16>, vector<128x128xbf16>, vector<16x128xf32> -> vector<16x128xf32>
    %c0_133 = arith.constant 0 : index
    %c0_134 = arith.constant 0 : index
    %229 = vector.load %arg14[%c0_133, %c0_134] : memref<1x128xf32, #tpu.memory_space<vmem>>, vector<1x128xf32>
    %230 = vector.broadcast %229 : vector<1x128xf32> to vector<16x128xf32>
    %231 = arith.addf %228, %230 : vector<16x128xf32>
    %232 = arith.addf %231, %217 : vector<16x128xf32>
    %c0_135 = arith.constant 0 : index
    %c0_136 = arith.constant 0 : index
    %233 = vector.load %arg15[%c0_135, %c0_136] : memref<1x128xf32, #tpu.memory_space<vmem>>, vector<1x128xf32>
    %c0_137 = arith.constant 0 : index
    %c0_138 = arith.constant 0 : index
    %234 = vector.load %arg16[%c0_137, %c0_138] : memref<1x128xf32, #tpu.memory_space<vmem>>, vector<1x128xf32>
    %cst_139 = arith.constant dense<0.000000e+00> : vector<16xf32>
    %235 = vector.multi_reduction <add>, %232, %cst_139 [1] : vector<16x128xf32> to vector<16xf32>
    %236 = vector.shape_cast %235 : vector<16xf32> to vector<16x1xf32>
    %cst_140 = arith.constant 3.125000e-02 : f32
    %237 = vector.broadcast %cst_140 : f32 to vector<16x1xf32>
    %238 = arith.mulf %236, %237 : vector<16x1xf32>
    %239 = vector.broadcast %238 : vector<16x1xf32> to vector<16x128xf32>
    %240 = arith.subf %232, %239 : vector<16x128xf32>
    %241 = vector.broadcast %6 : vector<1x128xf32> to vector<16x128xf32>
    %242 = arith.mulf %240, %241 : vector<16x128xf32>
    %243 = arith.mulf %242, %242 : vector<16x128xf32>
    %cst_141 = arith.constant dense<0.000000e+00> : vector<16xf32>
    %244 = vector.multi_reduction <add>, %243, %cst_141 [1] : vector<16x128xf32> to vector<16xf32>
    %245 = vector.shape_cast %244 : vector<16xf32> to vector<16x1xf32>
    %cst_142 = arith.constant 3.125000e-02 : f32
    %246 = vector.broadcast %cst_142 : f32 to vector<16x1xf32>
    %247 = arith.mulf %245, %246 : vector<16x1xf32>
    %cst_143 = arith.constant 9.99999974E-6 : f32
    %248 = vector.broadcast %cst_143 : f32 to vector<16x1xf32>
    %249 = arith.addf %247, %248 : vector<16x1xf32>
    %250 = math.rsqrt %249 : vector<16x1xf32>
    %251 = vector.broadcast %250 : vector<16x1xf32> to vector<16x128xf32>
    %252 = arith.mulf %242, %251 : vector<16x128xf32>
    %253 = vector.broadcast %233 : vector<1x128xf32> to vector<16x128xf32>
    %254 = arith.mulf %252, %253 : vector<16x128xf32>
    %255 = vector.broadcast %234 : vector<1x128xf32> to vector<16x128xf32>
    %256 = arith.addf %254, %255 : vector<16x128xf32>
    %c0_144 = arith.constant 0 : index
    %c0_145 = arith.constant 0 : index
    %257 = vector.load %arg17[%c0_144, %c0_145] : memref<16x128xf32, #tpu.memory_space<vmem>>, vector<16x128xf32>
    tpu.vector_store %arg17[%c0_144, %c0_145], %256 {strides = array<i32>} : memref<16x128xf32, #tpu.memory_space<vmem>>, vector<16x128xf32>,
    return
  }
}

</mosaic_0001>

<bundles_post_ra>
// kernel: tpu_custom_call.1
= control target key start
LH: loop header
LB: loop body
LE: loop exit
PB: predicated region body
PF: predicated region fallthrough
CT: control target
= control target key end

     0   :  { %s4972_s0 = inlined_call_operand.hbm [shape: f32[16,128], index: 0, kind: input, shape index: {}]   ;;  %s4973_s1 = inlined_call_operand.hbm [shape: bf16[4,128,128], index: 1, kind: input, shape index: {}]   ;;  %s4974_s2 = inlined_call_operand.hbm [shape: f32[4,1,128], index: 2, kind: input, shape index: {}]   ;;  %s4975_s3 = inlined_call_operand.hbm [shape: bf16[4,128,128], index: 3, kind: input, shape index: {}]   ;;  %s4976_s4 = inlined_call_operand.vmem [shape: f32[4,1,128], index: 4, kind: input, shape index: {}]   ;;  %s4977_s5 = inlined_call_operand.hbm [shape: bf16[4,128,128], index: 5, kind: input, shape index: {}]   ;;  %s4978_s6 = inlined_call_operand.vmem [shape: f32[4,1,128], index: 6, kind: input, shape index: {}]   ;;  %s4979_s7 = inlined_call_operand.hbm [shape: bf16[4,128,128], index: 7, kind: input, shape index: {}]   ;;  %s4980_s8 = inlined_call_operand.vmem [shape: f32[1,128], index: 8, kind: input, shape index: {}]   ;;  %s4981_s9 = inlined_call_operand.vmem [shape: f32[1,128], index: 9, kind: input, shape index: {}]   ;;  %s4982_s10 = inlined_call_operand.vmem [shape: f32[1,128], index: 10, kind: input, shape index: {}]   ;;  %s4983_s11 = inlined_call_operand.hbm [shape: bf16[128,128], index: 11, kind: input, shape index: {}]   ;;  %s4984_s12 = inlined_call_operand.vmem [shape: f32[1,128], index: 12, kind: input, shape index: {}]   ;;  %s4985_s13 = inlined_call_operand.hbm [shape: bf16[128,128], index: 13, kind: input, shape index: {}]   ;;  %s4986_s14 = inlined_call_operand.vmem [shape: f32[1,128], index: 14, kind: input, shape index: {}]   ;;  %s4987_s15 = inlined_call_operand.vmem [shape: f32[1,128], index: 15, kind: input, shape index: {}]   ;;  %s4988_s16 = inlined_call_operand.vmem [shape: f32[1,128], index: 16, kind: input, shape index: {}]   ;;  %s4989_s17 = inlined_call_operand.hbm [shape: f32[16,128], index: 17, kind: output, shape index: {}]  }
   0x1   :  { %4990 = sst [smem:[#allocation23_spill]] %s4972_s0 }
   0x2   :  { %4991 = sst [smem:[#allocation24_spill]] %s4973_s1 }
   0x3   :  { %22 = vsyncpa [#allocation3], 0 }
   0x4   :  { %23 = vsyncpa [#allocation6], 0 }
   0x5   :  { %24 = vsyncpa [#allocation9], 0 }
   0x6   :  { %25 = vsyncpa [#allocation12], 0 }
   0x7   :  { %26 = vsyncpa [#allocation15], 0 }
   0x8   :  { %27 = vsyncpa [#allocation4], 0  ;;  %s4461_s24 = smov [#allocation5]  }
   0x9   :  { %s45_s25 = sshll.u32 %s4461_s24, 4  ;;  %s46_s25 = int_to_ptr.vmem [resolvable:$true] %s45_s25 }
   0xa   :  { %s4277_s26 = scalar_lea.vmem %s46_s25, 4096  ;;  %p4282_p1 = scmp.lt.s32.totalorder %s46_s25, %s46_s25 }
   0xb   :  { %p4278_p0 = scmp.ne.s32.totalorder %s46_s25, %s4277_s26  ;;  %p4283_p2 = scmp.lt.s32.totalorder %s4277_s26, %s4277_s26 }
   0xd   :  { %p4284_p3 = por %p4283_p2, %p4282_p1 }
   0xf   :  { %p4285_p4 = pnand %p4284_p3, %p4278_p0 }
  0x11   :  { %4288 = shalt.err (!%p4285_p4)
}
  0x12   :  { %s4462_s27 = smov 64   ;;  %s4463_s28 = smov 4  }
  0x13   :  { %s4992_s30 = sld [smem:[#allocation24_spill]]  ;;  %s4464_s18 = smov [#allocation8]  }
  0x14   :  { %s69_s19 = sshll.u32 %s4464_s18, 4  ;;  %s4465_s1 = smov [#allocation11]   ;;  %s70_s19 = int_to_ptr.vmem [resolvable:$true] %s69_s19 }
  0x15   :  { %s97_s20 = sshll.u32 %s4465_s1, 4  ;;  %s4297_s21 = scalar_lea.vmem %s70_s19, 4096  ;;  %s98_s20 = int_to_ptr.vmem [resolvable:$true] %s97_s20 }
  0x16   :  { %p4298_p5 = scmp.ne.s32.totalorder %s70_s19, %s4297_s21  ;;  %p4302_p6 = scmp.lt.s32.totalorder %s70_s19, %s70_s19 }
  0x17   :  { %p4303_p7 = scmp.lt.s32.totalorder %s4297_s21, %s4297_s21 }
  0x19   :  { %51 = dma.hbm_to_vmem [thread:$0]  %s4992_s30, 4096, %s46_s25, [#allocation6], %s4462_s27, %s4462_s27, %s4463_s28  }
  0x1a   :  { %p4304_p8 = por %p4303_p7, %p4302_p6 }
  0x1c   :  { %p4305_p9 = pnand %p4304_p8, %p4298_p5 }
  0x1e   :  { %4308 = shalt.err (!%p4305_p9)
}
  0x1f   :  { %75 = dma.hbm_to_vmem [thread:$0]  %s4975_s3, 4096, %s70_s19, [#allocation9], %s4462_s27, %s4462_s27, %s4463_s28  }
  0x20   :  { %s4317_s24 = scalar_lea.vmem %s98_s20, 4096  ;;  %p4322_p11 = scmp.lt.s32.totalorder %s98_s20, %s98_s20 }
  0x21   :  { %p4318_p10 = scmp.ne.s32.totalorder %s98_s20, %s4317_s24  ;;  %p4323_p12 = scmp.lt.s32.totalorder %s4317_s24, %s4317_s24 }
  0x23   :  { %p4324_p13 = por %p4323_p12, %p4322_p11 }
  0x25   :  { %p4325_p0 = pnand %p4324_p13, %p4318_p10 }
  0x27   :  { %4328 = shalt.err (!%p4325_p0)
}
  0x28   :  { %103 = dma.hbm_to_vmem [thread:$0]  %s4979_s7, 4096, %s98_s20, [#allocation12], %s4462_s27, %s4462_s27, %s4463_s28  }
  0x29   :  { %s4466_s29 = smov [#allocation2]  }
  0x2a   :  { %s33_s0 = sshll.u32 %s4466_s29, 4  ;;  %s34_s0 = int_to_ptr.vmem [resolvable:$true] %s33_s0 }
  0x2b   :  { %s4337_s30 = scalar_lea.vmem %s34_s0, 256  ;;  %p4342_p2 = scmp.lt.s32.totalorder %s34_s0, %s34_s0 }
  0x2c   :  { %p4338_p1 = scmp.ne.s32.totalorder %s34_s0, %s4337_s30  ;;  %p4343_p3 = scmp.lt.s32.totalorder %s4337_s30, %s4337_s30 }
  0x2e   :  { %p4344_p4 = por %p4343_p3, %p4342_p2 }
  0x30   :  { %p4345_p5 = pnand %p4344_p4, %p4338_p1 }
  0x32   :  { %4348 = shalt.err (!%p4345_p5)
}
  0x33   :  { %s4467_s3 = smov 128   ;;  %s4468_s18 = smov 8  }
  0x34   :  { %s4993_s21 = sld [smem:[#allocation23_spill]]  ;;  %s4469_s7 = smov [#allocation7]  }
  0x35   :  { %s57_s20 = sshll.u32 %s4469_s7, 4  ;;  %s58_s20 = int_to_ptr.vmem [resolvable:$true] %s57_s20 }
  0x36   :  { %s4357_s22 = scalar_lea.vmem %s58_s20, 64  ;;  %p4362_p7 = scmp.lt.s32.totalorder %s58_s20, %s58_s20 }
  0x37   :  { %p4358_p6 = scmp.ne.s32.totalorder %s58_s20, %s4357_s22  ;;  %p4363_p8 = scmp.lt.s32.totalorder %s4357_s22, %s4357_s22 }
  0x39   :  { %p4364_p9 = por %p4363_p8, %p4362_p7 }
  0x3a   :  { %39 = dma.hbm_to_vmem [thread:$0]  %s4993_s21, 256, %s34_s0, [#allocation3], %s4467_s3, %s4467_s3, %s4468_s18  }
  0x3b   :  { %p4365_p10 = pnand %p4364_p9, %p4358_p6 }
  0x3d   :  { %4368 = shalt.err (!%p4365_p10)
}
  0x3e   :  { %s4470_s23 = smov 16   ;;  %s4471_s24 = smov 1  }
  0x3f   :  { %63 = dma.hbm_to_vmem [thread:$0]  %s4974_s2, 64, %s58_s20, [#allocation6], %s4470_s23, %s4470_s23, %s4471_s24  }
  0x40   :  { %s4472_s29 = smov [#allocation10]   ;;  %s4473_s0 = smov [#allocation13]  }
  0x41   :  { %s83_s30 = sshll.u32 %s4472_s29, 4  ;;  %s115_s19 = sshll.u32 %s4473_s0, 4  ;;  %s84_s30 = int_to_ptr.vmem [resolvable:$true] %s83_s30  ;;  %s116_s19 = int_to_ptr.vmem [resolvable:$true] %s115_s19 }
  0x42   :  { %s4377_s1 = scalar_lea.vmem %s84_s30, 4096  ;;  %p4382_p12 = scmp.lt.s32.totalorder %s84_s30, %s84_s30 }
  0x43   :  { %p4378_p11 = scmp.ne.s32.totalorder %s84_s30, %s4377_s1  ;;  %p4383_p13 = scmp.lt.s32.totalorder %s4377_s1, %s4377_s1 }
  0x45   :  { %p4384_p0 = por %p4383_p13, %p4382_p12 }
  0x47   :  { %p4385_p1 = pnand %p4384_p0, %p4378_p11 }
  0x49   :  { %4388 = shalt.err (!%p4385_p1)
}
  0x4a   :  { %89 = dma.hbm_to_vmem [thread:$0]  %s4977_s5, 4096, %s84_s30, [#allocation9], %s4462_s27, %s4462_s27, %s4463_s28  }
  0x4b   :  { %s4397_s2 = scalar_lea.vmem %s116_s19, 1024  ;;  %p4402_p3 = scmp.lt.s32.totalorder %s116_s19, %s116_s19 }
  0x4c   :  { %p4398_p2 = scmp.ne.s32.totalorder %s116_s19, %s4397_s2  ;;  %p4403_p4 = scmp.lt.s32.totalorder %s4397_s2, %s4397_s2 }
  0x4e   :  { %p4404_p5 = por %p4403_p4, %p4402_p3 }
  0x50   :  { %p4405_p6 = pnand %p4404_p5, %p4398_p2 }
  0x52   :  { %4408 = shalt.err (!%p4405_p6)
}
  0x53   :  { %121 = dma.hbm_to_vmem [thread:$0]  %s4983_s11, 1024, %s116_s19, [#allocation12], %s4462_s27, %s4462_s27, %s4463_s28  }
  0x54   :  { %s4474_s23 = smov [#allocation14]  }
  0x55   :  { %s129_s24 = sshll.u32 %s4474_s23, 4  ;;  %s130_s24 = int_to_ptr.vmem [resolvable:$true] %s129_s24 }
  0x56   :  { %s4417_s25 = scalar_lea.vmem %s130_s24, 1024  ;;  %p4422_p8 = scmp.lt.s32.totalorder %s130_s24, %s130_s24 }
  0x57   :  { %p4418_p7 = scmp.ne.s32.totalorder %s130_s24, %s4417_s25  ;;  %p4423_p9 = scmp.lt.s32.totalorder %s4417_s25, %s4417_s25 }
  0x59   :  { %p4424_p10 = por %p4423_p9, %p4422_p8 }
  0x5b   :  { %p4425_p11 = pnand %p4424_p10, %p4418_p7 }
  0x5d   :  { %4428 = shalt.err (!%p4425_p11)
}
  0x5e   :  { %135 = dma.hbm_to_vmem [thread:$0]  %s4985_s13, 1024, %s130_s24, [#allocation15], %s4462_s27, %s4462_s27, %s4463_s28  }
  0x5f   :  { %4449 = dma.done.wait [#allocation3], 256  }
  0x60   :  { %4450 = vsyncadd [#allocation3], 4294967040 }
  0x61   :  { %4451 = dma.done.wait [#allocation6], 4160  }
  0x62   :  { %4452 = vsyncadd [#allocation6], 4294963136 }
  0x63   :  { %4453 = dma.done.wait [#allocation9], 8192  }
  0x64   :  { %4454 = vsyncadd [#allocation9], 4294959104 }
  0x65   :  { %4455 = dma.done.wait [#allocation12], 5120  }
  0x66   :  { %4456 = vsyncadd [#allocation12], 4294962176 }
  0x67   :  { %4457 = dma.done.wait [#allocation15], 1024  }
  0x68   :  { %4458 = vsyncadd [#allocation15], 4294966272  ;;  %v4475_v0 = vmov 0.0   ;;  %vm4476_vm0 = vmmov 0   ;;  %v4083_v1 = vld [vmem:[#allocation8 + $0x38] sm:$0xff]   ;;  %v4085_v3 = vld [vmem:[#allocation8 + $0x30] sm:$0xff]  }
  0x69   :  { %3630 = vmatprep.subr.bf16.mxu1 %v4475_v0  ;;  %3610 = vmatprep.subr.bf16.mxu0 %v4475_v0  ;;  %v4084_v2 = vld [vmem:[#allocation5 + $0x38] sm:$0xff]   ;;  %v4086_v4 = vld [vmem:[#allocation5 + $0x30] sm:$0xff]   ;;  %v4088_v6 = vld [vmem:[#allocation5 + $0x28] sm:$0xff]   ;;  %vm613_vm1 = vcmask 64512   ;;  %vm641_vm2 = vcmask 1043456   ;;  %s4477_s29 = smov [#allocation16]  }
  0x6a   :  { %3646 = vmatprep.mubr.msk.bf16.mxu1 %vm4476_vm0, %v4475_v0  ;;  %3626 = vmatprep.mubr.msk.bf16.mxu0 %vm4476_vm0, %v4475_v0  ;;  %v4087_v5 = vld [vmem:[#allocation8 + $0x28] sm:$0xff]   ;;  %v4089_v7 = vld [vmem:[#allocation8 + $0x20] sm:$0xff]   ;;  %v4091_v9 = vld [vmem:[#allocation8 + $0x18] sm:$0xff]   ;;  %s3174_s30 = sshll.u32 %s4477_s29, 4  ;;  %s3175_s30 = int_to_ptr.vmem [resolvable:$true] %s3174_s30 }
  0x6b   :  { %3631 = vmatpush3.bf16.msra.mxu1 %v4083_v1  ;;  %3611 = vmatpush3.bf16.msra.mxu0 %v4084_v2  ;;  %v4090_v8 = vld [vmem:[#allocation5 + $0x20] sm:$0xff]   ;;  %v4092_v10 = vld [vmem:[#allocation5 + $0x18] sm:$0xff]   ;;  %v4094_v12 = vld [vmem:[#allocation5 + $0x10] sm:$0xff]   ;;  %s4429_s0 = scalar_lea.vmem %s3175_s30, 256  ;;  %p4434_p13 = scmp.lt.s32.totalorder %s3175_s30, %s3175_s30 }
  0x6c   :  { %3632 = vmatprep.subr.bf16.mxu1 %v4475_v0  ;;  %3612 = vmatprep.subr.bf16.mxu0 %v4475_v0  ;;  %v4093_v11 = vld [vmem:[#allocation8 + $0x10] sm:$0xff]   ;;  %v4095_v13 = vld [vmem:[#allocation8 + $0x8] sm:$0xff]   ;;  %v4097_v15 = vld [vmem:[#allocation8] sm:$0xff]   ;;  %p4430_p12 = scmp.ne.s32.totalorder %s3175_s30, %s4429_s0  ;;  %p4435_p0 = scmp.lt.s32.totalorder %s4429_s0, %s4429_s0 }
  0x6d   :  { %v4096_v14 = vld [vmem:[#allocation5 + $0x8] sm:$0xff]   ;;  %v167_v16 = vld [vmem:[#allocation2] sm:$0xff]  ;;  %v168_v17 = vld [vmem:[#allocation2 + $0x8] sm:$0xff] }
  0x6e   :  { %v4098_v18 = vld [vmem:[#allocation5] sm:$0xff]   ;;  %v4633_v19 = vpack.c.bf16 %v168_v17, %v167_v16  ;;  %v3200_v20 = vld [vmem:[%s4976_s4] ss:$0 sm:$0xff]  ;;  %v4100_v39 = vld [vmem:[#allocation10 + $0x30] sm:$0xff]   ;;  %p4436_p1 = por %p4435_p0, %p4434_p13 }
  0x6f   :  { %3633 = vmatpush3.bf16.msra.mxu1 %v4085_v3  ;;  %3613 = vmatpush3.bf16.msra.mxu0 %v4086_v4  ;;  %v3191_v23 = vld [vmem:[#allocation7] ss:$0 sm:$0xff]  ;;  %v4101_v40 = vld [vmem:[#allocation10 + $0x28] sm:$0xff]   ;;  %v4102_v41 = vld [vmem:[#allocation10 + $0x20] sm:$0xff]  }
  0x70   :  { %3634 = vmatprep.subr.bf16.mxu1 %v4475_v0  ;;  %3614 = vmatprep.subr.bf16.mxu0 %v4475_v0  ;;  %v4099_v38 = vld [vmem:[#allocation10 + $0x38] sm:$0xff]   ;;  %v4104_v43 = vld [vmem:[#allocation10 + $0x10] sm:$0xff]   ;;  %v4105_v44 = vld [vmem:[#allocation10 + $0x8] sm:$0xff]   ;;  %p4437_p2 = pnand %p4436_p1, %p4430_p12 }
  0x71   :  { %v4103_v42 = vld [vmem:[#allocation10 + $0x18] sm:$0xff]   ;;  %v4106_v45 = vld [vmem:[#allocation10] sm:$0xff]   ;;  %v3209_v3 = vld [vmem:[%s4978_s6] ss:$0 sm:$0xff] }
  0x72   :  { %v4116_v16 = vld [vmem:[#allocation5 + $0x58] sm:$0xff]   ;;  %v4118_v17 = vld [vmem:[#allocation5 + $0x50] sm:$0xff]  }
  0x73   :  { %3635 = vmatpush3.bf16.msra.mxu1 %v4087_v5  ;;  %3615 = vmatpush3.bf16.msra.mxu0 %v4088_v6 }
  0x74   :  { %3636 = vmatprep.subr.bf16.mxu1 %v4475_v0  ;;  %3616 = vmatprep.subr.bf16.mxu0 %v4475_v0 }
  0x77   :  { %3637 = vmatpush3.bf16.msra.mxu1 %v4089_v7  ;;  %3617 = vmatpush3.bf16.msra.mxu0 %v4090_v8 }
  0x78   :  { %3638 = vmatprep.subr.bf16.mxu1 %v4475_v0  ;;  %3618 = vmatprep.subr.bf16.mxu0 %v4475_v0 }
  0x7b   :  { %3639 = vmatpush3.bf16.msra.mxu1 %v4091_v9  ;;  %3619 = vmatpush3.bf16.msra.mxu0 %v4092_v10 }
  0x7c   :  { %3640 = vmatprep.subr.bf16.mxu1 %v4475_v0  ;;  %3620 = vmatprep.subr.bf16.mxu0 %v4475_v0 }
  0x7f   :  { %3641 = vmatpush3.bf16.msra.mxu1 %v4093_v11  ;;  %3621 = vmatpush3.bf16.msra.mxu0 %v4094_v12  ;;  %v4108_v12 = vld [vmem:[#allocation5 + $0x78] sm:$0xff]  }
  0x80   :  { %3642 = vmatprep.subr.bf16.mxu1 %v4475_v0  ;;  %3622 = vmatprep.subr.bf16.mxu0 %v4475_v0 }
  0x83   :  { %3643 = vmatpush3.bf16.msra.mxu1 %v4095_v13  ;;  %3623 = vmatpush3.bf16.msra.mxu0 %v4096_v14  ;;  %v4110_v13 = vld [vmem:[#allocation5 + $0x70] sm:$0xff]   ;;  %v4112_v14 = vld [vmem:[#allocation5 + $0x68] sm:$0xff]  }
  0x84   :  { %3644 = vmatprep.subr.bf16.mxu1 %v4475_v0  ;;  %3624 = vmatprep.subr.bf16.mxu0 %v4475_v0 }
  0x87   :  { %3645 = vmatpush3.bf16.msra.mxu1 %v4097_v15  ;;  %3625 = vmatpush3.bf16.msra.mxu0 %v4098_v18  ;;  %v4114_v15 = vld [vmem:[#allocation5 + $0x60] sm:$0xff]   ;;  %v4120_v18 = vld [vmem:[#allocation5 + $0x48] sm:$0xff]  }
  0x88   :  { %3670 = vmatprep.subr.bf16.mxu1 %v4475_v0  ;;  %3650 = vmatprep.subr.bf16.mxu0 %v4475_v0 }
  0x8a   :  { %3647 = vmatmul.mubr.bf16.vlgmr.msra.gmra.mxu1 %v4633_v19  ;;  %3627 = vmatmul.mubr.bf16.vlgmr.msra.gmra.mxu0 %v4633_v19 }
  0x8b   :  { %3672 = vmatprep.mubr.msk.bf16.mxu1 %vm4476_vm0, %v4475_v0  ;;  %3666 = vmatprep.mubr.msk.bf16.mxu0 %vm4476_vm0, %v4475_v0 }
  0x8c   :  { %3651 = vmatpush3.bf16.msra.mxu0 %v4099_v38  ;;  %v4121_v38 = vld [vmem:[#allocation8 + $0x40] sm:$0xff]  }
  0x8d   :  { %3652 = vmatprep.subr.bf16.mxu0 %v4475_v0 }
  0x90   :  { %3653 = vmatpush3.bf16.msra.mxu0 %v4100_v39 }
  0x91   :  { %3654 = vmatprep.subr.bf16.mxu0 %v4475_v0 }
  0x94   :  { %3655 = vmatpush3.bf16.msra.mxu0 %v4101_v40 }
  0x95   :  { %3656 = vmatprep.subr.bf16.mxu0 %v4475_v0 }
  0x98   :  { %3657 = vmatpush3.bf16.msra.mxu0 %v4102_v41 }
  0x99   :  { %3658 = vmatprep.subr.bf16.mxu0 %v4475_v0 }
  0x9c   :  { %3659 = vmatpush3.bf16.msra.mxu0 %v4103_v42 }
  0x9d   :  { %3660 = vmatprep.subr.bf16.mxu0 %v4475_v0 }
  0xa0   :  { %3661 = vmatpush3.bf16.msra.mxu0 %v4104_v43 }
  0xa1   :  { %3662 = vmatprep.subr.bf16.mxu0 %v4475_v0 }
  0xa4   :  { %3663 = vmatpush3.bf16.msra.mxu0 %v4105_v44 }
  0xa5   :  { %3664 = vmatprep.subr.bf16.mxu0 %v4475_v0 }
  0xa8   :  { %3665 = vmatpush3.bf16.msra.mxu0 %v4106_v45 }
  0xa9   :  { %3694 = vmatprep.subr.bf16.mxu0 %v4475_v0 }
  0xab   :  { %3667 = vmatmul.mubr.bf16.vlgmr.msra.gmra.mxu0 %v4633_v19 }
  0xac   :  { %3710 = vmatprep.mubr.msk.bf16.mxu0 %vm4476_vm0, %v4475_v0  ;;  %3695 = vmatpush3.bf16.msra.mxu0 %v4108_v12 }
  0xad   :  { %3696 = vmatprep.subr.bf16.mxu0 %v4475_v0 }
  0xb0   :  { %3697 = vmatpush3.bf16.msra.mxu0 %v4110_v13 }
  0xb1   :  { %3698 = vmatprep.subr.bf16.mxu0 %v4475_v0 }
  0xb4   :  { %3699 = vmatpush3.bf16.msra.mxu0 %v4112_v14 }
  0xb5   :  { %3700 = vmatprep.subr.bf16.mxu0 %v4475_v0 }
  0xb8   :  { %3701 = vmatpush3.bf16.msra.mxu0 %v4114_v15 }
  0xb9   :  { %3702 = vmatprep.subr.bf16.mxu0 %v4475_v0 }
  0xbc   :  { %3703 = vmatpush3.bf16.msra.mxu0 %v4116_v16 }
  0xbd   :  { %3704 = vmatprep.subr.bf16.mxu0 %v4475_v0 }
  0xc0   :  { %3705 = vmatpush3.bf16.msra.mxu0 %v4118_v17 }
  0xc1   :  { %3706 = vmatprep.subr.bf16.mxu0 %v4475_v0 }
  0xc4   :  { %3707 = vmatpush3.bf16.msra.mxu0 %v4120_v18 }
  0xc5   :  { %3708 = vmatprep.subr.bf16.mxu0 %v4475_v0 }
 0x14a   :  { %v392_v21 = vpop.f32.mrf.mxu1  ;;  %v280_v24 = vpop.f32.mrf.mxu0 }
 0x14b   :  { %v393_v22 = vadd.f32 %v3200_v20, %v392_v21  ;;  %v281_v28 = vadd.f32 %v3191_v23, %v280_v24 }
 0x14c   :  { %v3648_v25 = vpop.f32.mrf.mxu1  ;;  %v3628_v27 = vpop.f32.mrf.mxu0 }
 0x14d   :  { %v3394_v26 = vpack.c.bf16 %v393_v22, %v393_v22  ;;  %v3392_v34 = vpack.c.bf16 %v281_v28, %v281_v28 }
 0x14e   :  { %v395_v29 = vpop.f32.mrf.mxu1  ;;  %v283_v30 = vpop.f32.mrf.mxu0 }
 0x14f   :  { %3671 = vmatpush3.bf16.xpose.msra.mxu1 %v3394_v26  ;;  %v396_v32 = vadd.f32 %v3200_v20, %v395_v29  ;;  %v284_v36 = vadd.f32 %v3191_v23, %v283_v30  ;;  %v4122_v20 = vld [vmem:[#allocation5 + $0x40] sm:$0xff]  }
 0x150   :  { %v3649_v31 = vpop.f32.mrf.mxu1  ;;  %3676 = vmatprep.subr.bf16.mxu1 %v4475_v0  ;;  %v3629_v33 = vpop.f32.mrf.mxu0  ;;  %3709 = vmatpush3.bf16.msra.mxu0 %v4122_v20  ;;  %v4107_v30 = vld [vmem:[#allocation8 + $0x78] sm:$0xff]  }
 0x151   :  { %v3395_v35 = vpack.c.bf16 %v396_v32, %v396_v32  ;;  %v3393_v37 = vpack.c.bf16 %v284_v36, %v284_v36  ;;  %3734 = vmatprep.subr.bf16.mxu0 %v4475_v0  ;;  %v4109_v32 = vld [vmem:[#allocation8 + $0x70] sm:$0xff]   ;;  %v4111_v33 = vld [vmem:[#allocation8 + $0x68] sm:$0xff]  }
 0x152   :  { %v4117_v36 = vld [vmem:[#allocation8 + $0x50] sm:$0xff]  }
 0x153   :  { %3711 = vmatmul.mubr.bf16.vlgmr.msra.gmra.mxu0 %v4633_v19 }
 0x154   :  { %3750 = vmatprep.mubr.msk.bf16.mxu0 %vm4476_vm0, %v4475_v0 }
 0x156   :  { %3673 = vmatmul.mubr.bf16.vlgmr.msra.gmra.mxu1 %v3392_v34  ;;  %v4113_v34 = vld [vmem:[#allocation8 + $0x60] sm:$0xff]  }
 0x157   :  { %3677 = vmatpush3.bf16.xpose.msra.mxu1 %v3395_v35  ;;  %3678 = vmatprep.mubr.msk.bf16.mxu1 %vm4476_vm0, %v4475_v0  ;;  %v4115_v35 = vld [vmem:[#allocation8 + $0x58] sm:$0xff]  }
 0x158   :  { %3682 = vmatprep.subr.bf16.mxu1 %v4475_v0 }
 0x15e   :  { %3679 = vmatmul.mubr.bf16.vlgmr.msra.gmra.mxu1 %v3393_v37  ;;  %v4119_v37 = vld [vmem:[#allocation8 + $0x48] sm:$0xff]  }
 0x15f   :  { %3684 = vmatprep.mubr.msk.bf16.mxu1 %vm4476_vm0, %v4475_v0 }
 0x16b   :  { %v504_v4 = vpop.f32.mrf.mxu0 }
 0x16c   :  { %v505_v5 = vadd.f32 %v3209_v3, %v504_v4  ;;  %v4124_v4 = vld [vmem:[#allocation10 + $0x70] sm:$0xff]  }
 0x16d   :  { %v3668_v6 = vpop.f32.mrf.mxu0 }
 0x16e   :  { %v3396_v7 = vpack.c.bf16 %v505_v5, %v505_v5  ;;  %v4125_v5 = vld [vmem:[#allocation10 + $0x68] sm:$0xff]   ;;  %v4126_v6 = vld [vmem:[#allocation10 + $0x60] sm:$0xff]  }
 0x16f   :  { %v507_v8 = vpop.f32.mrf.mxu0 }
 0x170   :  { %v643_v9 = vsel %vm641_vm2, %v3396_v7, 0  ;;  %v508_v10 = vadd.f32 %v3209_v3, %v507_v8  ;;  %v4123_v3 = vld [vmem:[#allocation10 + $0x78] sm:$0xff]   ;;  %v4128_v8 = vld [vmem:[#allocation10 + $0x50] sm:$0xff]  }
 0x171   :  { %v3669_v11 = vpop.f32.mrf.mxu0  ;;  %3683 = vmatpush3.bf16.msra.mxu1 %v643_v9  ;;  %3735 = vmatpush3.bf16.msra.mxu0 %v4123_v3  ;;  %v4127_v7 = vld [vmem:[#allocation10 + $0x58] sm:$0xff]   ;;  %v4129_v9 = vld [vmem:[#allocation10 + $0x48] sm:$0xff]  }
 0x172   :  { %3688 = vmatprep.subr.bf16.mxu1 %v4475_v0  ;;  %v3397_v24 = vpack.c.bf16 %v508_v10, %v508_v10  ;;  %3736 = vmatprep.subr.bf16.mxu0 %v4475_v0  ;;  %v4130_v10 = vld [vmem:[#allocation10 + $0x40] sm:$0xff]   ;;  %v4137_v3 = vld [vmem:[#allocation11 + $0x8] sm:$0xff]  }
 0x174   :  { %v689_v27 = vsel %vm641_vm2, %v3397_v24, 0 }
 0x175   :  { %3737 = vmatpush3.bf16.msra.mxu0 %v4124_v4  ;;  %v4138_v4 = vld [vmem:[#allocation11] sm:$0xff]  }
 0x176   :  { %3738 = vmatprep.subr.bf16.mxu0 %v4475_v0 }
 0x179   :  { %3739 = vmatpush3.bf16.msra.mxu0 %v4125_v5  ;;  %v4144_v5 = vld [vmem:[#allocation8 + $0xb8] sm:$0xff]  }
 0x17a   :  { %3740 = vmatprep.subr.bf16.mxu0 %v4475_v0 }
 0x17d   :  { %3741 = vmatpush3.bf16.msra.mxu0 %v4126_v6  ;;  %v4146_v6 = vld [vmem:[#allocation8 + $0xb0] sm:$0xff]  }
 0x17e   :  { %3742 = vmatprep.subr.bf16.mxu0 %v4475_v0 }
 0x181   :  { %3743 = vmatpush3.bf16.msra.mxu0 %v4127_v7  ;;  %v4147_v7 = vld [vmem:[#allocation11 + $0x48] sm:$0xff]  }
 0x182   :  { %3744 = vmatprep.subr.bf16.mxu0 %v4475_v0 }
 0x185   :  { %3745 = vmatpush3.bf16.msra.mxu0 %v4128_v8  ;;  %v4148_v8 = vld [vmem:[#allocation8 + $0xa8] sm:$0xff]  }
 0x186   :  { %3746 = vmatprep.subr.bf16.mxu0 %v4475_v0 }
 0x189   :  { %3747 = vmatpush3.bf16.msra.mxu0 %v4129_v9  ;;  %v4149_v9 = vld [vmem:[#allocation11 + $0x40] sm:$0xff]  }
 0x18a   :  { %3748 = vmatprep.subr.bf16.mxu0 %v4475_v0 }
 0x18d   :  { %3749 = vmatpush3.bf16.msra.mxu0 %v4130_v10  ;;  %v4156_v10 = vld [vmem:[#allocation8 + $0x88] sm:$0xff]  }
 0x18e   :  { %3778 = vmatprep.subr.bf16.mxu0 %v4475_v0 }
 0x190   :  { %3751 = vmatmul.mubr.bf16.vlgmr.msra.gmra.mxu0 %v4633_v19 }
 0x191   :  { %3794 = vmatprep.mubr.msk.bf16.mxu0 %vm4476_vm0, %v4475_v0 }
 0x213   :  { %v855_v39 = vpop.f32.mrf.mxu0 }
 0x215   :  { %v3712_v40 = vpop.f32.mrf.mxu0 }
 0x216   :  { %v567_v46 = vpop.f32.mrf.mxu1 }
 0x217   :  { %v614_v47 = vsel %vm613_vm1, %v567_v46, -inf  ;;  %v858_v41 = vpop.f32.mrf.mxu0 }
 0x218   :  { %615 = vmax.xlane.f32.xlu0 %v614_v47  ;;  %v3674_v48 = vpop.f32.mrf.mxu1 }
 0x219   :  { %v3713_v42 = vpop.f32.mrf.mxu0 }
 0x21a   :  { %v570_v49 = vpop.f32.mrf.mxu1  ;;  %v4140_v42 = vld [vmem:[#allocation11 + $0x70] sm:$0xff]  }
 0x21c   :  { %v3675_v50 = vpop.f32.mrf.mxu1 }
 0x21e   :  { %v607_v51 = vpop.f32.mrf.mxu1 }
 0x21f   :  { %v617_v52 = vsel %vm613_vm1, %v607_v51, -inf }
 0x220   :  { %618 = vmax.xlane.f32.xlu0 %v617_v52  ;;  %v3680_v53 = vpop.f32.mrf.mxu1  ;;  %v3236_v52 = vld [vmem:[%s4976_s4 + $0x1] ss:$0 sm:$0xff] }
 0x222   :  { %v610_v54 = vpop.f32.mrf.mxu1 }
 0x224   :  { %v3681_v55 = vpop.f32.mrf.mxu1 }
 0x225   :  { %v3226_v55 = vld [vmem:[#allocation7 + $0x1] ss:$0 sm:$0xff] }
 0x2a1   :  { %v616_v56 = vpop.xlane.xlu0 %615 }
 0x2a2   :  { %v620_v57 = vsub.f32 %v567_v46, %v616_v56 }
 0x2a4   :  { %v622_v58 = vmul.f32 1.442695, %v620_v57 }
 0x2a6   :  { %4227 = vpow2.f32 %v622_v58  ;;  %v856_v58 = vadd.f32 %v3226_v55, %v855_v39 }
 0x2a9   :  { %v619_v59 = vpop.xlane.xlu0 %618 }
 0x2aa   :  { %v621_v60 = vsub.f32 %v607_v51, %v619_v59 }
 0x2ac   :  { %v624_v61 = vmul.f32 1.442695, %v621_v60 }
 0x2ae   :  { %4229 = vpow2.f32 %v624_v61 }
 0x2b3   :  { %v4228_v62 = vpop.eup %4227 }
 0x2b4   :  { %v626_v63 = vsel %vm613_vm1, %v4228_v62, 0.0 }
 0x2b5   :  { %627 = vadd.xlane.f32.xlu1 %v626_v63 }
 0x2bb   :  { %v4230_v1 = vpop.eup %4229 }
 0x2bc   :  { %v629_v2 = vsel %vm613_vm1, %v4230_v1, 0.0 }
 0x2bd   :  { %630 = vadd.xlane.f32.xlu1 %v629_v2 }
 0x33e   :  { %v628_v21 = vpop.xlane.xlu1 %627 }
 0x33f   :  { %4231 = vrcp.f32 %v628_v21 }
 0x346   :  { %v631_v22 = vpop.xlane.xlu1 %630 }
 0x347   :  { %4233 = vrcp.f32 %v631_v22 }
 0x34c   :  { %v4232_v23 = vpop.eup %4231 }
 0x34d   :  { %v634_v25 = vmul.f32 %v4232_v23, %v4228_v62  ;;  %v3398_v62 = vpack.c.bf16 %v856_v58, %v856_v58 }
 0x34f   :  { %v636_v26 = vpack.c.bf16 %v634_v25, %v634_v25 }
 0x351   :  { %3685 = vmatmul.mubr.msk.bf16.vlgmr.msra.gmra.mxu1 %vm613_vm1, %v636_v26 }
 0x352   :  { %3689 = vmatpush3.bf16.msra.mxu1 %v689_v27  ;;  %3690 = vmatprep.mubr.msk.bf16.mxu1 %vm4476_vm0, %v4475_v0 }
 0x353   :  { %3714 = vmatprep.subr.bf16.mxu1 %v4475_v0 }
 0x354   :  { %v4234_v28 = vpop.eup %4233 }
 0x355   :  { %v635_v29 = vmul.f32 %v4234_v28, %v4230_v1  ;;  %v859_v1 = vadd.f32 %v3226_v55, %v858_v41  ;;  %v4139_v41 = vld [vmem:[#allocation11 + $0x78] sm:$0xff]  }
 0x356   :  { %3779 = vmatpush3.bf16.msra.mxu0 %v4139_v41 }
 0x357   :  { %v637_v31 = vpack.c.bf16 %v635_v29, %v635_v29  ;;  %v3399_v2 = vpack.c.bf16 %v859_v1, %v859_v1  ;;  %3780 = vmatprep.subr.bf16.mxu0 %v4475_v0  ;;  %v4135_v1 = vld [vmem:[#allocation11 + $0x18] sm:$0xff]  }
 0x359   :  { %3691 = vmatmul.mubr.msk.bf16.vlgmr.msra.gmra.mxu1 %vm613_vm1, %v637_v31 }
 0x35a   :  { %3715 = vmatpush3.bf16.msra.mxu1 %v4107_v30  ;;  %3730 = vmatprep.mubr.msk.bf16.mxu1 %vm4476_vm0, %v4475_v0 }
 0x35b   :  { %3716 = vmatprep.subr.bf16.mxu1 %v4475_v0  ;;  %3781 = vmatpush3.bf16.msra.mxu0 %v4140_v42 }
 0x35c   :  { %3782 = vmatprep.subr.bf16.mxu0 %v4475_v0 }
 0x35e   :  { %3717 = vmatpush3.bf16.msra.mxu1 %v4109_v32  ;;  %v3246_v32 = vld [vmem:[%s4978_s6 + $0x1] ss:$0 sm:$0xff] }
 0x35f   :  { %3718 = vmatprep.subr.bf16.mxu1 %v4475_v0 }
 0x362   :  { %3719 = vmatpush3.bf16.msra.mxu1 %v4111_v33  ;;  %v1083_v33 = vpop.f32.mrf.mxu0 }
 0x363   :  { %3720 = vmatprep.subr.bf16.mxu1 %v4475_v0 }
 0x366   :  { %3721 = vmatpush3.bf16.msra.mxu1 %v4113_v34  ;;  %v1084_v34 = vadd.f32 %v3246_v32, %v1083_v33 }
 0x367   :  { %3722 = vmatprep.subr.bf16.mxu1 %v4475_v0 }
 0x36a   :  { %3723 = vmatpush3.bf16.msra.mxu1 %v4115_v35  ;;  %v3752_v35 = vpop.f32.mrf.mxu0 }
 0x36b   :  { %3724 = vmatprep.subr.bf16.mxu1 %v4475_v0 }
 0x36e   :  { %3725 = vmatpush3.bf16.msra.mxu1 %v4117_v36  ;;  %v3402_v36 = vpack.c.bf16 %v1084_v34, %v1084_v34  ;;  %v3289_v34 = vld [vmem:[%s4976_s4 + $0x2] ss:$0 sm:$0xff] }
 0x36f   :  { %3726 = vmatprep.subr.bf16.mxu1 %v4475_v0 }
 0x372   :  { %3727 = vmatpush3.bf16.msra.mxu1 %v4119_v37  ;;  %v1086_v37 = vpop.f32.mrf.mxu0 }
 0x373   :  { %3728 = vmatprep.subr.bf16.mxu1 %v4475_v0  ;;  %v1087_v39 = vadd.f32 %v3246_v32, %v1086_v37 }
 0x374   :  { %v3753_v40 = vpop.f32.mrf.mxu0 }
 0x376   :  { %3729 = vmatpush3.bf16.msra.mxu1 %v4121_v38  ;;  %v1220_v38 = vsel %vm641_vm2, %v3402_v36, 0 }
 0x377   :  { %3754 = vmatprep.subr.bf16.mxu1 %v4475_v0 }
 0x379   :  { %3731 = vmatmul.mubr.bf16.vlgmr.msra.gmra.mxu1 %v4633_v19 }
 0x37a   :  { %3756 = vmatprep.mubr.msk.bf16.mxu1 %vm4476_vm0, %v4475_v0 }
 0x411   :  { %v4702_v43 = vpop.f32.mrf.mxu1 }
 0x413   :  { %v3686_v44 = vpop.f32.mrf.mxu1 }
 0x414   :  { %v4141_v44 = vld [vmem:[#allocation11 + $0x68] sm:$0xff]  }
 0x415   :  { %v682_v45 = vpop.f32.mrf.mxu1  ;;  %3783 = vmatpush3.bf16.msra.mxu0 %v4141_v44 }
 0x416   :  { %v4142_v45 = vld [vmem:[#allocation11 + $0x60] sm:$0xff]   ;;  %3784 = vmatprep.subr.bf16.mxu0 %v4475_v0 }
 0x417   :  { %v3687_v46 = vpop.f32.mrf.mxu1 }
 0x418   :  { %v4143_v46 = vld [vmem:[#allocation11 + $0x58] sm:$0xff]  }
 0x419   :  { %v4704_v47 = vpop.f32.mrf.mxu1  ;;  %3785 = vmatpush3.bf16.msra.mxu0 %v4142_v45 }
 0x41a   :  { %v731_v48 = vpack.c.bf16 %v4704_v47, %v4702_v43  ;;  %3786 = vmatprep.subr.bf16.mxu0 %v4475_v0  ;;  %v4150_v43 = vld [vmem:[#allocation8 + $0xa0] sm:$0xff]   ;;  %v4152_v47 = vld [vmem:[#allocation8 + $0x98] sm:$0xff]  }
 0x41b   :  { %v3692_v49 = vpop.f32.mrf.mxu1 }
 0x41c   :  { %v4145_v49 = vld [vmem:[#allocation11 + $0x50] sm:$0xff]  }
 0x41d   :  { %v728_v50 = vpop.f32.mrf.mxu1  ;;  %3787 = vmatpush3.bf16.msra.mxu0 %v4143_v46 }
 0x41e   :  { %3788 = vmatprep.subr.bf16.mxu0 %v4475_v0 }
 0x41f   :  { %v3693_v51 = vpop.f32.mrf.mxu1 }
 0x421   :  { %3789 = vmatpush3.bf16.msra.mxu0 %v4145_v49  ;;  %v3279_v49 = vld [vmem:[#allocation7 + $0x2] ss:$0 sm:$0xff] }
 0x422   :  { %3790 = vmatprep.subr.bf16.mxu0 %v4475_v0 }
 0x425   :  { %3791 = vmatpush3.bf16.msra.mxu0 %v4147_v7 }
 0x426   :  { %3792 = vmatprep.subr.bf16.mxu0 %v4475_v0 }
 0x429   :  { %3793 = vmatpush3.bf16.msra.mxu0 %v4149_v9 }
 0x42a   :  { %3818 = vmatprep.subr.bf16.mxu0 %v4475_v0 }
 0x439   :  { %v969_v53 = vpop.f32.mrf.mxu1 }
 0x43a   :  { %v970_v54 = vadd.f32 %v3236_v52, %v969_v53  ;;  %v3403_v53 = vpack.c.bf16 %v1087_v39, %v1087_v39 }
 0x43b   :  { %v3732_v56 = vpop.f32.mrf.mxu1 }
 0x43c   :  { %v3400_v57 = vpack.c.bf16 %v970_v54, %v970_v54  ;;  %v1266_v56 = vsel %vm641_vm2, %v3403_v53, 0 }
 0x43d   :  { %v972_v59 = vpop.f32.mrf.mxu1 }
 0x43e   :  { %3755 = vmatpush3.bf16.xpose.msra.mxu1 %v3400_v57  ;;  %v973_v61 = vadd.f32 %v3236_v52, %v972_v59  ;;  %v4131_v59 = vld [vmem:[#allocation11 + $0x38] sm:$0xff]  }
 0x43f   :  { %v3733_v60 = vpop.f32.mrf.mxu1  ;;  %3760 = vmatprep.subr.bf16.mxu1 %v4475_v0 }
 0x440   :  { %v3401_v63 = vpack.c.bf16 %v973_v61, %v973_v61  ;;  %v4132_v61 = vld [vmem:[#allocation11 + $0x30] sm:$0xff]  }
 0x445   :  { %3757 = vmatmul.mubr.bf16.vlgmr.msra.gmra.mxu1 %v3398_v62  ;;  %v4133_v62 = vld [vmem:[#allocation11 + $0x28] sm:$0xff]  }
 0x446   :  { %3761 = vmatpush3.bf16.xpose.msra.mxu1 %v3401_v63  ;;  %3762 = vmatprep.mubr.msk.bf16.mxu1 %vm4476_vm0, %v4475_v0  ;;  %v4134_v63 = vld [vmem:[#allocation11 + $0x20] sm:$0xff]  }
 0x447   :  { %3766 = vmatprep.subr.bf16.mxu1 %v4475_v0 }
 0x44d   :  { %3763 = vmatmul.mubr.bf16.vlgmr.msra.gmra.mxu1 %v3399_v2  ;;  %v4136_v2 = vld [vmem:[#allocation11 + $0x10] sm:$0xff]  }
 0x44e   :  { %3768 = vmatprep.mubr.msk.bf16.mxu1 %vm4476_vm0, %v4475_v0  ;;  %3767 = vmatpush3.bf16.msra.mxu1 %v1220_v38 }
 0x44f   :  { %3772 = vmatprep.subr.bf16.mxu1 %v4475_v0 }
 0x505   :  { %v1146_v11 = vpop.f32.mrf.mxu1 }
 0x506   :  { %v1192_v12 = vsel %vm613_vm1, %v1146_v11, -inf }
 0x507   :  { %1193 = vmax.xlane.f32.xlu0 %v1192_v12  ;;  %v3758_v13 = vpop.f32.mrf.mxu1 }
 0x509   :  { %v1149_v14 = vpop.f32.mrf.mxu1 }
 0x50b   :  { %v3759_v15 = vpop.f32.mrf.mxu1 }
 0x50d   :  { %v1186_v16 = vpop.f32.mrf.mxu1 }
 0x50e   :  { %v1195_v17 = vsel %vm613_vm1, %v1186_v16, -inf }
 0x50f   :  { %1196 = vmax.xlane.f32.xlu1 %v1195_v17  ;;  %v3764_v18 = vpop.f32.mrf.mxu1  ;;  %v4151_v17 = vld [vmem:[#allocation5 + $0xb8] sm:$0xff]  }
 0x511   :  { %v1189_v20 = vpop.f32.mrf.mxu1 }
 0x513   :  { %v3765_v21 = vpop.f32.mrf.mxu1 }
 0x590   :  { %v1194_v22 = vpop.xlane.xlu0 %1193 }
 0x591   :  { %v1198_v23 = vsub.f32 %v1146_v11, %v1194_v22  ;;  %v4158_v11 = vld [vmem:[#allocation8 + $0x80] sm:$0xff]   ;;  %v4153_v22 = vld [vmem:[#allocation5 + $0xb0] sm:$0xff]  }
 0x593   :  { %v1200_v24 = vmul.f32 1.442695, %v1198_v23 }
 0x595   :  { %4235 = vpow2.f32 %v1200_v24  ;;  %v4155_v24 = vld [vmem:[#allocation5 + $0xa8] sm:$0xff]  }
 0x598   :  { %v1197_v25 = vpop.xlane.xlu1 %1196 }
 0x599   :  { %v1199_v26 = vsub.f32 %v1186_v16, %v1197_v25  ;;  %v4157_v25 = vld [vmem:[#allocation5 + $0xa0] sm:$0xff]  }
 0x59b   :  { %v1202_v27 = vmul.f32 1.442695, %v1199_v26  ;;  %v4159_v26 = vld [vmem:[#allocation5 + $0x98] sm:$0xff]  }
 0x59d   :  { %4237 = vpow2.f32 %v1202_v27  ;;  %v4160_v27 = vld [vmem:[#allocation5 + $0x90] sm:$0xff]  }
 0x5a2   :  { %v4236_v28 = vpop.eup %4235 }
 0x5a3   :  { %v1204_v29 = vsel %vm613_vm1, %v4236_v28, 0.0 }
 0x5a4   :  { %1205 = vadd.xlane.f32.xlu0 %v1204_v29  ;;  %v4162_v29 = vld [vmem:[#allocation5 + $0x80] sm:$0xff]  }
 0x5aa   :  { %v4238_v30 = vpop.eup %4237 }
 0x5ab   :  { %v1207_v31 = vsel %vm613_vm1, %v4238_v30, 0.0 }
 0x5ac   :  { %1208 = vadd.xlane.f32.xlu1 %v1207_v31 }
 0x62d   :  { %v1206_v50 = vpop.xlane.xlu0 %1205 }
 0x62e   :  { %4239 = vrcp.f32 %v1206_v50 }
 0x635   :  { %v1209_v51 = vpop.xlane.xlu1 %1208 }
 0x636   :  { %4241 = vrcp.f32 %v1209_v51 }
 0x63b   :  { %v4240_v52 = vpop.eup %4239 }
 0x63c   :  { %v1212_v54 = vmul.f32 %v4240_v52, %v4236_v28  ;;  %v4161_v28 = vld [vmem:[#allocation5 + $0x88] sm:$0xff]  }
 0x63e   :  { %v1214_v55 = vpack.c.bf16 %v1212_v54, %v1212_v54 }
 0x640   :  { %3769 = vmatmul.mubr.msk.bf16.vlgmr.msra.gmra.mxu1 %vm613_vm1, %v1214_v55 }
 0x641   :  { %3773 = vmatpush3.bf16.msra.mxu1 %v1266_v56  ;;  %3774 = vmatprep.mubr.msk.bf16.mxu1 %vm4476_vm0, %v4475_v0 }
 0x642   :  { %3798 = vmatprep.subr.bf16.mxu1 %v4475_v0 }
 0x643   :  { %v4242_v57 = vpop.eup %4241 }
 0x644   :  { %v1213_v58 = vmul.f32 %v4242_v57, %v4238_v30 }
 0x646   :  { %v1215_v60 = vpack.c.bf16 %v1213_v58, %v1213_v58 }
 0x648   :  { %3775 = vmatmul.mubr.msk.bf16.vlgmr.msra.gmra.mxu1 %vm613_vm1, %v1215_v60  ;;  %v4164_v60 = vld [vmem:[#allocation10 + $0xb0] sm:$0xff]  }
 0x649   :  { %3799 = vmatpush3.bf16.msra.mxu1 %v4131_v59  ;;  %3814 = vmatprep.mubr.msk.bf16.mxu1 %vm4476_vm0, %v4475_v0  ;;  %v4163_v59 = vld [vmem:[#allocation10 + $0xb8] sm:$0xff]  }
 0x64a   :  { %3800 = vmatprep.subr.bf16.mxu1 %v4475_v0 }
 0x64d   :  { %3801 = vmatpush3.bf16.msra.mxu1 %v4132_v61  ;;  %v4165_v61 = vld [vmem:[#allocation10 + $0xa8] sm:$0xff]  }
 0x64e   :  { %3802 = vmatprep.subr.bf16.mxu1 %v4475_v0 }
 0x651   :  { %3803 = vmatpush3.bf16.msra.mxu1 %v4133_v62  ;;  %v4166_v62 = vld [vmem:[#allocation10 + $0xa0] sm:$0xff]  }
 0x652   :  { %3804 = vmatprep.subr.bf16.mxu1 %v4475_v0 }
 0x655   :  { %3805 = vmatpush3.bf16.msra.mxu1 %v4134_v63  ;;  %v4167_v63 = vld [vmem:[#allocation10 + $0x98] sm:$0xff]  }
 0x656   :  { %3806 = vmatprep.subr.bf16.mxu1 %v4475_v0 }
 0x659   :  { %3807 = vmatpush3.bf16.msra.mxu1 %v4135_v1  ;;  %v4168_v1 = vld [vmem:[#allocation10 + $0x90] sm:$0xff]  }
 0x65a   :  { %3808 = vmatprep.subr.bf16.mxu1 %v4475_v0 }
 0x65d   :  { %3809 = vmatpush3.bf16.msra.mxu1 %v4136_v2  ;;  %v4169_v2 = vld [vmem:[#allocation10 + $0x88] sm:$0xff]  }
 0x65e   :  { %3810 = vmatprep.subr.bf16.mxu1 %v4475_v0 }
 0x661   :  { %3811 = vmatpush3.bf16.msra.mxu1 %v4137_v3  ;;  %v4170_v3 = vld [vmem:[#allocation10 + $0x80] sm:$0xff]  }
 0x662   :  { %3812 = vmatprep.subr.bf16.mxu1 %v4475_v0 }
 0x665   :  { %3813 = vmatpush3.bf16.msra.mxu1 %v4138_v4 }
 0x666   :  { %3838 = vmatprep.subr.bf16.mxu1 %v4475_v0 }
 0x668   :  { %3815 = vmatmul.mubr.bf16.vlgmr.msra.gmra.mxu1 %v731_v48  ;;  %v4154_v48 = vld [vmem:[#allocation8 + $0x90] sm:$0xff]  }
 0x669   :  { %3839 = vmatpush3.bf16.msra.mxu1 %v4144_v5  ;;  %3854 = vmatprep.mubr.msk.bf16.mxu1 %vm4476_vm0, %v4475_v0 }
 0x66a   :  { %3840 = vmatprep.subr.bf16.mxu1 %v4475_v0 }
 0x66d   :  { %3841 = vmatpush3.bf16.msra.mxu1 %v4146_v6 }
 0x66e   :  { %3842 = vmatprep.subr.bf16.mxu1 %v4475_v0 }
 0x671   :  { %3843 = vmatpush3.bf16.msra.mxu1 %v4148_v8 }
 0x672   :  { %3844 = vmatprep.subr.bf16.mxu1 %v4475_v0 }
 0x675   :  { %3845 = vmatpush3.bf16.msra.mxu1 %v4150_v43 }
 0x676   :  { %3846 = vmatprep.subr.bf16.mxu1 %v4475_v0 }
 0x679   :  { %3847 = vmatpush3.bf16.msra.mxu1 %v4152_v47 }
 0x67a   :  { %3848 = vmatprep.subr.bf16.mxu1 %v4475_v0 }
 0x67d   :  { %3849 = vmatpush3.bf16.msra.mxu1 %v4154_v48 }
 0x67e   :  { %3850 = vmatprep.subr.bf16.mxu1 %v4475_v0 }
 0x681   :  { %3851 = vmatpush3.bf16.msra.mxu1 %v4156_v10 }
 0x682   :  { %3852 = vmatprep.subr.bf16.mxu1 %v4475_v0 }
 0x685   :  { %3853 = vmatpush3.bf16.msra.mxu1 %v4158_v11 }
 0x686   :  { %3878 = vmatprep.subr.bf16.mxu1 %v4475_v0 }
 0x688   :  { %3855 = vmatmul.mubr.bf16.vlgmr.msra.gmra.mxu1 %v4633_v19 }
 0x689   :  { %3880 = vmatprep.mubr.msk.bf16.mxu1 %vm4476_vm0, %v4475_v0 }
 0x700   :  { %v1256_v12 = vpop.f32.mrf.mxu1 }
 0x702   :  { %v3770_v13 = vpop.f32.mrf.mxu1 }
 0x704   :  { %v1259_v14 = vpop.f32.mrf.mxu1 }
 0x706   :  { %v3771_v15 = vpop.f32.mrf.mxu1 }
 0x708   :  { %v1302_v16 = vpop.f32.mrf.mxu1 }
 0x709   :  { %v1308_v18 = vpack.c.bf16 %v1302_v16, %v1256_v12 }
 0x70a   :  { %v3776_v20 = vpop.f32.mrf.mxu1 }
 0x70b   :  { %3795 = vmatmul.mubr.bf16.vlgmr.msra.gmra.mxu0 %v1308_v18 }
 0x70c   :  { %3819 = vmatpush3.bf16.msra.mxu0 %v4151_v17  ;;  %v1305_v21 = vpop.f32.mrf.mxu1  ;;  %3834 = vmatprep.mubr.msk.bf16.mxu0 %vm4476_vm0, %v4475_v0 }
 0x70d   :  { %3820 = vmatprep.subr.bf16.mxu0 %v4475_v0 }
 0x70e   :  { %v3777_v23 = vpop.f32.mrf.mxu1 }
 0x710   :  { %3821 = vmatpush3.bf16.msra.mxu0 %v4153_v22  ;;  %v3299_v22 = vld [vmem:[%s4978_s6 + $0x2] ss:$0 sm:$0xff] }
 0x711   :  { %3822 = vmatprep.subr.bf16.mxu0 %v4475_v0 }
 0x714   :  { %3823 = vmatpush3.bf16.msra.mxu0 %v4155_v24 }
 0x715   :  { %3824 = vmatprep.subr.bf16.mxu0 %v4475_v0 }
 0x718   :  { %3825 = vmatpush3.bf16.msra.mxu0 %v4157_v25 }
 0x719   :  { %3826 = vmatprep.subr.bf16.mxu0 %v4475_v0 }
 0x71c   :  { %3827 = vmatpush3.bf16.msra.mxu0 %v4159_v26 }
 0x71d   :  { %3828 = vmatprep.subr.bf16.mxu0 %v4475_v0 }
 0x720   :  { %3829 = vmatpush3.bf16.msra.mxu0 %v4160_v27 }
 0x721   :  { %3830 = vmatprep.subr.bf16.mxu0 %v4475_v0 }
 0x724   :  { %3831 = vmatpush3.bf16.msra.mxu0 %v4161_v28 }
 0x725   :  { %3832 = vmatprep.subr.bf16.mxu0 %v4475_v0 }
 0x728   :  { %v4786_v30 = vpop.f32.mrf.mxu1  ;;  %3833 = vmatpush3.bf16.msra.mxu0 %v4162_v29 }
 0x729   :  { %3858 = vmatprep.subr.bf16.mxu0 %v4475_v0 }
 0x72a   :  { %v3816_v31 = vpop.f32.mrf.mxu1 }
 0x72b   :  { %3835 = vmatmul.mubr.bf16.vlgmr.msra.gmra.mxu0 %v4633_v19 }
 0x72c   :  { %v4790_v32 = vpop.f32.mrf.mxu1  ;;  %3874 = vmatprep.mubr.msk.bf16.mxu0 %vm4476_vm0, %v4475_v0  ;;  %3859 = vmatpush3.bf16.msra.mxu0 %v4163_v59  ;;  %v4186_v59 = vld [vmem:[#allocation5 + $0xe0] sm:$0xff]  }
 0x72d   :  { %3860 = vmatprep.subr.bf16.mxu0 %v4475_v0 }
 0x72e   :  { %v3817_v33 = vpop.f32.mrf.mxu1 }
 0x72f   :  { %v4171_v33 = vld [vmem:[#allocation11 + $0xb8] sm:$0xff]  }
 0x730   :  { %3861 = vmatpush3.bf16.msra.mxu0 %v4164_v60  ;;  %v4188_v60 = vld [vmem:[#allocation5 + $0xd8] sm:$0xff]  }
 0x731   :  { %3862 = vmatprep.subr.bf16.mxu0 %v4475_v0 }
 0x734   :  { %3863 = vmatpush3.bf16.msra.mxu0 %v4165_v61  ;;  %v4190_v61 = vld [vmem:[#allocation5 + $0xd0] sm:$0xff]  }
 0x735   :  { %3864 = vmatprep.subr.bf16.mxu0 %v4475_v0 }
 0x738   :  { %3865 = vmatpush3.bf16.msra.mxu0 %v4166_v62  ;;  %v4192_v62 = vld [vmem:[#allocation5 + $0xc8] sm:$0xff]  }
 0x739   :  { %3866 = vmatprep.subr.bf16.mxu0 %v4475_v0 }
 0x73c   :  { %3867 = vmatpush3.bf16.msra.mxu0 %v4167_v63  ;;  %v4194_v63 = vld [vmem:[#allocation5 + $0xc0] sm:$0xff]  }
 0x73d   :  { %3868 = vmatprep.subr.bf16.mxu0 %v4475_v0 }
 0x740   :  { %3869 = vmatpush3.bf16.msra.mxu0 %v4168_v1  ;;  %v4195_v1 = vld [vmem:[#allocation10 + $0xf8] sm:$0xff]  }
 0x741   :  { %3870 = vmatprep.subr.bf16.mxu0 %v4475_v0 }
 0x744   :  { %3871 = vmatpush3.bf16.msra.mxu0 %v4169_v2 }
 0x745   :  { %3872 = vmatprep.subr.bf16.mxu0 %v4475_v0 }
 0x748   :  { %v1725_v35 = vpop.f32.mrf.mxu1  ;;  %3873 = vmatpush3.bf16.msra.mxu0 %v4170_v3 }
 0x749   :  { %v1726_v36 = vadd.f32 %v3289_v34, %v1725_v35  ;;  %3902 = vmatprep.subr.bf16.mxu0 %v4475_v0  ;;  %v4173_v35 = vld [vmem:[#allocation11 + $0xa8] sm:$0xff]  }
 0x74a   :  { %v3856_v37 = vpop.f32.mrf.mxu1 }
 0x74b   :  { %v3406_v38 = vpack.c.bf16 %v1726_v36, %v1726_v36  ;;  %3875 = vmatmul.mubr.bf16.vlgmr.msra.gmra.mxu0 %v4633_v19  ;;  %v4174_v36 = vld [vmem:[#allocation11 + $0xa0] sm:$0xff]   ;;  %v4175_v37 = vld [vmem:[#allocation11 + $0x98] sm:$0xff]  }
 0x74c   :  { %v1728_v39 = vpop.f32.mrf.mxu1  ;;  %3918 = vmatprep.mubr.msk.bf16.mxu0 %vm4476_vm0, %v4475_v0  ;;  %3903 = vmatpush3.bf16.msra.mxu0 %v4171_v33 }
 0x74d   :  { %v1729_v40 = vadd.f32 %v3289_v34, %v1728_v39  ;;  %3879 = vmatpush3.bf16.xpose.msra.mxu1 %v3406_v38  ;;  %v4172_v34 = vld [vmem:[#allocation11 + $0xb0] sm:$0xff]   ;;  %3904 = vmatprep.subr.bf16.mxu0 %v4475_v0 }
 0x74e   :  { %v3857_v41 = vpop.f32.mrf.mxu1  ;;  %3884 = vmatprep.subr.bf16.mxu1 %v4475_v0  ;;  %v4176_v38 = vld [vmem:[#allocation11 + $0x90] sm:$0xff]  }
 0x74f   :  { %v3407_v54 = vpack.c.bf16 %v1729_v40, %v1729_v40 }
 0x750   :  { %3905 = vmatpush3.bf16.msra.mxu0 %v4172_v34 }
 0x751   :  { %3906 = vmatprep.subr.bf16.mxu0 %v4475_v0 }
 0x754   :  { %3907 = vmatpush3.bf16.msra.mxu0 %v4173_v35 }
 0x755   :  { %3908 = vmatprep.subr.bf16.mxu0 %v4475_v0 }
 0x758   :  { %3909 = vmatpush3.bf16.msra.mxu0 %v4174_v36 }
 0x759   :  { %3910 = vmatprep.subr.bf16.mxu0 %v4475_v0 }
 0x75c   :  { %3911 = vmatpush3.bf16.msra.mxu0 %v4175_v37  ;;  %v3334_v37 = vld [vmem:[%s4976_s4 + $0x3] ss:$0 sm:$0xff] }
 0x75d   :  { %3912 = vmatprep.subr.bf16.mxu0 %v4475_v0 }
 0x760   :  { %3913 = vmatpush3.bf16.msra.mxu0 %v4176_v38 }
 0x761   :  { %3914 = vmatprep.subr.bf16.mxu0 %v4475_v0 }
 0x7cb   :  { %v4798_v42 = vpop.f32.mrf.mxu0 }
 0x7cd   :  { %v3796_v44 = vpop.f32.mrf.mxu0 }
 0x7cf   :  { %v4800_v45 = vpop.f32.mrf.mxu0 }
 0x7d0   :  { %v1501_v34 = vadd.f32 %v4790_v32, %v4800_v45 }
 0x7d1   :  { %v3797_v46 = vpop.f32.mrf.mxu0 }
 0x7eb   :  { %v1611_v50 = vpop.f32.mrf.mxu0 }
 0x7ec   :  { %v1612_v51 = vadd.f32 %v3279_v49, %v1611_v50 }
 0x7ed   :  { %v3836_v52 = vpop.f32.mrf.mxu0 }
 0x7ee   :  { %v3404_v53 = vpack.c.bf16 %v1612_v51, %v1612_v51 }
 0x7ef   :  { %v1614_v55 = vpop.f32.mrf.mxu0 }
 0x7f0   :  { %3881 = vmatmul.mubr.bf16.vlgmr.msra.gmra.mxu1 %v3404_v53  ;;  %v1615_v57 = vadd.f32 %v3279_v49, %v1614_v55  ;;  %v4178_v55 = vld [vmem:[#allocation11 + $0x80] sm:$0xff]  }
 0x7f1   :  { %3885 = vmatpush3.bf16.xpose.msra.mxu1 %v3407_v54  ;;  %v3837_v56 = vpop.f32.mrf.mxu0  ;;  %3886 = vmatprep.mubr.msk.bf16.mxu1 %vm4476_vm0, %v4475_v0  ;;  %v4177_v54 = vld [vmem:[#allocation11 + $0x88] sm:$0xff]  }
 0x7f2   :  { %3890 = vmatprep.subr.bf16.mxu1 %v4475_v0  ;;  %v3405_v58 = vpack.c.bf16 %v1615_v57, %v1615_v57  ;;  %3915 = vmatpush3.bf16.msra.mxu0 %v4177_v54  ;;  %v4180_v56 = vld [vmem:[#allocation5 + $0xf8] sm:$0xff]   ;;  %v4182_v57 = vld [vmem:[#allocation5 + $0xf0] sm:$0xff]  }
 0x7f3   :  { %3916 = vmatprep.subr.bf16.mxu0 %v4475_v0 }
 0x7f6   :  { %3917 = vmatpush3.bf16.msra.mxu0 %v4178_v55 }
 0x7f7   :  { %3942 = vmatprep.subr.bf16.mxu0 %v4475_v0 }
 0x7f8   :  { %3887 = vmatmul.mubr.bf16.vlgmr.msra.gmra.mxu1 %v3405_v58  ;;  %v4184_v58 = vld [vmem:[#allocation5 + $0xe8] sm:$0xff]  }
 0x7f9   :  { %3892 = vmatprep.mubr.msk.bf16.mxu1 %vm4476_vm0, %v4475_v0 }
 0x80b   :  { %v1839_v23 = vpop.f32.mrf.mxu0 }
 0x80c   :  { %v1840_v24 = vadd.f32 %v3299_v22, %v1839_v23  ;;  %v4202_v23 = vld [vmem:[#allocation10 + $0xc0] sm:$0xff]  }
 0x80d   :  { %v3876_v25 = vpop.f32.mrf.mxu0 }
 0x80e   :  { %v3408_v26 = vpack.c.bf16 %v1840_v24, %v1840_v24 }
 0x80f   :  { %v1842_v27 = vpop.f32.mrf.mxu0 }
 0x810   :  { %v1976_v28 = vsel %vm641_vm2, %v3408_v26, 0  ;;  %v1843_v29 = vadd.f32 %v3299_v22, %v1842_v27  ;;  %v4201_v22 = vld [vmem:[#allocation10 + $0xc8] sm:$0xff]  }
 0x811   :  { %v3877_v31 = vpop.f32.mrf.mxu0  ;;  %3891 = vmatpush3.bf16.msra.mxu1 %v1976_v28  ;;  %v1498_v28 = vadd.f32 %v4786_v30, %v4798_v42 }
 0x812   :  { %3896 = vmatprep.subr.bf16.mxu1 %v4475_v0  ;;  %v3409_v44 = vpack.c.bf16 %v1843_v29, %v1843_v29 }
 0x814   :  { %v2022_v50 = vsel %vm641_vm2, %v3409_v44, 0 }
 0x8b0   :  { %v1902_v4 = vpop.f32.mrf.mxu1 }
 0x8b1   :  { %v1948_v5 = vsel %vm613_vm1, %v1902_v4, -inf }
 0x8b2   :  { %1949 = vmax.xlane.f32.xlu0 %v1948_v5  ;;  %v3882_v6 = vpop.f32.mrf.mxu1 }
 0x8b4   :  { %v1905_v7 = vpop.f32.mrf.mxu1 }
 0x8b5   :  { %v4179_v7 = vld [vmem:[#allocation8 + $0xf8] sm:$0xff]  }
 0x8b6   :  { %v3883_v8 = vpop.f32.mrf.mxu1 }
 0x8b8   :  { %v1942_v9 = vpop.f32.mrf.mxu1 }
 0x8b9   :  { %v1951_v43 = vsel %vm613_vm1, %v1942_v9, -inf }
 0x8ba   :  { %1952 = vmax.xlane.f32.xlu1 %v1951_v43  ;;  %v3888_v47 = vpop.f32.mrf.mxu1 }
 0x8bb   :  { %v4181_v47 = vld [vmem:[#allocation8 + $0xf0] sm:$0xff]  }
 0x8bc   :  { %v1945_v48 = vpop.f32.mrf.mxu1 }
 0x8be   :  { %v3889_v10 = vpop.f32.mrf.mxu1 }
 0x8bf   :  { %v4183_v10 = vld [vmem:[#allocation8 + $0xe8] sm:$0xff]  }
 0x93b   :  { %v1950_v11 = vpop.xlane.xlu0 %1949 }
 0x93c   :  { %v1954_v12 = vsub.f32 %v1902_v4, %v1950_v11  ;;  %v4185_v11 = vld [vmem:[#allocation8 + $0xe0] sm:$0xff]  }
 0x93e   :  { %v1956_v13 = vmul.f32 1.442695, %v1954_v12  ;;  %v4187_v12 = vld [vmem:[#allocation8 + $0xd8] sm:$0xff]  }
 0x940   :  { %4243 = vpow2.f32 %v1956_v13  ;;  %v4189_v13 = vld [vmem:[#allocation8 + $0xd0] sm:$0xff]  }
 0x943   :  { %v1953_v14 = vpop.xlane.xlu1 %1952 }
 0x944   :  { %v1955_v15 = vsub.f32 %v1942_v9, %v1953_v14  ;;  %v4191_v14 = vld [vmem:[#allocation8 + $0xc8] sm:$0xff]  }
 0x946   :  { %v1958_v16 = vmul.f32 1.442695, %v1955_v15  ;;  %v4193_v15 = vld [vmem:[#allocation8 + $0xc0] sm:$0xff]  }
 0x948   :  { %4245 = vpow2.f32 %v1958_v16  ;;  %v4196_v16 = vld [vmem:[#allocation10 + $0xf0] sm:$0xff]  }
 0x94d   :  { %v4244_v17 = vpop.eup %4243 }
 0x94e   :  { %v1960_v18 = vsel %vm613_vm1, %v4244_v17, 0.0 }
 0x94f   :  { %1961 = vadd.xlane.f32.xlu0 %v1960_v18  ;;  %v4198_v18 = vld [vmem:[#allocation10 + $0xe0] sm:$0xff]  }
 0x955   :  { %v4246_v20 = vpop.eup %4245 }
 0x956   :  { %v1963_v21 = vsel %vm613_vm1, %v4246_v20, 0.0 }
 0x957   :  { %1964 = vadd.xlane.f32.xlu1 %v1963_v21  ;;  %v4200_v21 = vld [vmem:[#allocation10 + $0xd0] sm:$0xff]  }
 0x9d8   :  { %v1962_v39 = vpop.xlane.xlu0 %1961 }
 0x9d9   :  { %4247 = vrcp.f32 %v1962_v39 }
 0x9e0   :  { %v1965_v40 = vpop.xlane.xlu1 %1964 }
 0x9e1   :  { %4249 = vrcp.f32 %v1965_v40  ;;  %v3324_v40 = vld [vmem:[#allocation7 + $0x3] ss:$0 sm:$0xff] }
 0x9e6   :  { %v4248_v41 = vpop.eup %4247 }
 0x9e7   :  { %v1968_v46 = vmul.f32 %v4248_v41, %v4244_v17  ;;  %v4197_v17 = vld [vmem:[#allocation10 + $0xe8] sm:$0xff]  }
 0x9e9   :  { %v1970_v49 = vpack.c.bf16 %v1968_v46, %v1968_v46 }
 0x9eb   :  { %3893 = vmatmul.mubr.msk.bf16.vlgmr.msra.gmra.mxu1 %vm613_vm1, %v1970_v49 }
 0x9ec   :  { %3897 = vmatpush3.bf16.msra.mxu1 %v2022_v50  ;;  %3898 = vmatprep.mubr.msk.bf16.mxu1 %vm4476_vm0, %v4475_v0 }
 0x9ed   :  { %3922 = vmatprep.subr.bf16.mxu1 %v4475_v0 }
 0x9ee   :  { %v4250_v51 = vpop.eup %4249 }
 0x9ef   :  { %v1969_v52 = vmul.f32 %v4250_v51, %v4246_v20  ;;  %v4199_v20 = vld [vmem:[#allocation10 + $0xd8] sm:$0xff]  }
 0x9f1   :  { %v1971_v53 = vpack.c.bf16 %v1969_v52, %v1969_v52  ;;  %v3344_v52 = vld [vmem:[%s4978_s6 + $0x3] ss:$0 sm:$0xff] }
 0x9f3   :  { %3899 = vmatmul.mubr.msk.bf16.vlgmr.msra.gmra.mxu1 %vm613_vm1, %v1971_v53 }
 0x9f4   :  { %3938 = vmatprep.mubr.msk.bf16.mxu1 %vm4476_vm0, %v4475_v0  ;;  %3923 = vmatpush3.bf16.msra.mxu1 %v4180_v56 }
 0x9f5   :  { %3924 = vmatprep.subr.bf16.mxu1 %v4475_v0 }
 0x9f8   :  { %3925 = vmatpush3.bf16.msra.mxu1 %v4182_v57 }
 0x9f9   :  { %3926 = vmatprep.subr.bf16.mxu1 %v4475_v0 }
 0x9fc   :  { %3927 = vmatpush3.bf16.msra.mxu1 %v4184_v58 }
 0x9fd   :  { %3928 = vmatprep.subr.bf16.mxu1 %v4475_v0 }
 0xa00   :  { %3929 = vmatpush3.bf16.msra.mxu1 %v4186_v59 }
 0xa01   :  { %3930 = vmatprep.subr.bf16.mxu1 %v4475_v0 }
 0xa04   :  { %3931 = vmatpush3.bf16.msra.mxu1 %v4188_v60 }
 0xa05   :  { %3932 = vmatprep.subr.bf16.mxu1 %v4475_v0 }
 0xa08   :  { %3933 = vmatpush3.bf16.msra.mxu1 %v4190_v61 }
 0xa09   :  { %3934 = vmatprep.subr.bf16.mxu1 %v4475_v0 }
 0xa0c   :  { %3935 = vmatpush3.bf16.msra.mxu1 %v4192_v62 }
 0xa0d   :  { %3936 = vmatprep.subr.bf16.mxu1 %v4475_v0 }
 0xa10   :  { %3937 = vmatpush3.bf16.msra.mxu1 %v4194_v63 }
 0xa11   :  { %3962 = vmatprep.subr.bf16.mxu1 %v4475_v0 }
 0xa13   :  { %3939 = vmatmul.mubr.bf16.vlgmr.msra.gmra.mxu1 %v4633_v19 }
 0xa14   :  { %3963 = vmatpush3.bf16.msra.mxu1 %v4195_v1  ;;  %3978 = vmatprep.mubr.msk.bf16.mxu1 %vm4476_vm0, %v4475_v0 }
 0xa15   :  { %3964 = vmatprep.subr.bf16.mxu1 %v4475_v0 }
 0xa18   :  { %3965 = vmatpush3.bf16.msra.mxu1 %v4196_v16  ;;  %v4204_v16 = vld [vmem:[#allocation11 + $0xf0] sm:$0xff]  }
 0xa19   :  { %3966 = vmatprep.subr.bf16.mxu1 %v4475_v0 }
 0xa1c   :  { %3967 = vmatpush3.bf16.msra.mxu1 %v4197_v17  ;;  %v4205_v17 = vld [vmem:[#allocation11 + $0xe8] sm:$0xff]  }
 0xa1d   :  { %3968 = vmatprep.subr.bf16.mxu1 %v4475_v0 }
 0xa20   :  { %3969 = vmatpush3.bf16.msra.mxu1 %v4198_v18  ;;  %v4206_v18 = vld [vmem:[#allocation11 + $0xe0] sm:$0xff]  }
 0xa21   :  { %3970 = vmatprep.subr.bf16.mxu1 %v4475_v0 }
 0xa24   :  { %3971 = vmatpush3.bf16.msra.mxu1 %v4199_v20  ;;  %v4207_v20 = vld [vmem:[#allocation11 + $0xd8] sm:$0xff]  }
 0xa25   :  { %3972 = vmatprep.subr.bf16.mxu1 %v4475_v0 }
 0xa28   :  { %3973 = vmatpush3.bf16.msra.mxu1 %v4200_v21 }
 0xa29   :  { %3974 = vmatprep.subr.bf16.mxu1 %v4475_v0 }
 0xa2c   :  { %3975 = vmatpush3.bf16.msra.mxu1 %v4201_v22 }
 0xa2d   :  { %3976 = vmatprep.subr.bf16.mxu1 %v4475_v0 }
 0xa30   :  { %3977 = vmatpush3.bf16.msra.mxu1 %v4202_v23 }
 0xa31   :  { %3982 = vmatprep.subr.bf16.mxu1 %v4475_v0 }
 0xa33   :  { %3979 = vmatmul.mubr.bf16.vlgmr.msra.gmra.mxu1 %v4633_v19 }
 0xa34   :  { %3984 = vmatprep.mubr.msk.bf16.mxu1 %vm4476_vm0, %v4475_v0 }
 0xaab   :  { %v2012_v2 = vpop.f32.mrf.mxu1 }
 0xaad   :  { %v3894_v3 = vpop.f32.mrf.mxu1 }
 0xaaf   :  { %v2015_v4 = vpop.f32.mrf.mxu1 }
 0xab1   :  { %v3895_v5 = vpop.f32.mrf.mxu1 }
 0xab3   :  { %v2058_v6 = vpop.f32.mrf.mxu1 }
 0xab4   :  { %v2064_v8 = vpack.c.bf16 %v2058_v6, %v2012_v2 }
 0xab5   :  { %v3900_v9 = vpop.f32.mrf.mxu1 }
 0xab6   :  { %3919 = vmatmul.mubr.bf16.vlgmr.msra.gmra.mxu0 %v2064_v8 }
 0xab7   :  { %3943 = vmatpush3.bf16.msra.mxu0 %v4179_v7  ;;  %v2061_v43 = vpop.f32.mrf.mxu1  ;;  %3958 = vmatprep.mubr.msk.bf16.mxu0 %vm4476_vm0, %v4475_v0 }
 0xab8   :  { %3944 = vmatprep.subr.bf16.mxu0 %v4475_v0 }
 0xab9   :  { %v3901_v48 = vpop.f32.mrf.mxu1 }
 0xabb   :  { %3945 = vmatpush3.bf16.msra.mxu0 %v4181_v47 }
 0xabc   :  { %3946 = vmatprep.subr.bf16.mxu0 %v4475_v0 }
 0xabf   :  { %3947 = vmatpush3.bf16.msra.mxu0 %v4183_v10 }
 0xac0   :  { %3948 = vmatprep.subr.bf16.mxu0 %v4475_v0 }
 0xac3   :  { %3949 = vmatpush3.bf16.msra.mxu0 %v4185_v11 }
 0xac4   :  { %3950 = vmatprep.subr.bf16.mxu0 %v4475_v0 }
 0xac7   :  { %3951 = vmatpush3.bf16.msra.mxu0 %v4187_v12 }
 0xac8   :  { %3952 = vmatprep.subr.bf16.mxu0 %v4475_v0 }
 0xacb   :  { %3953 = vmatpush3.bf16.msra.mxu0 %v4189_v13 }
 0xacc   :  { %3954 = vmatprep.subr.bf16.mxu0 %v4475_v0 }
 0xacf   :  { %3955 = vmatpush3.bf16.msra.mxu0 %v4191_v14 }
 0xad0   :  { %3956 = vmatprep.subr.bf16.mxu0 %v4475_v0 }
 0xad3   :  { %3957 = vmatpush3.bf16.msra.mxu0 %v4193_v15  ;;  %v2280_v24 = vpop.f32.mrf.mxu1  ;;  %v4203_v15 = vld [vmem:[#allocation11 + $0xf8] sm:$0xff]  }
 0xad4   :  { %4006 = vmatprep.subr.bf16.mxu0 %v4475_v0  ;;  %v2281_v42 = vadd.f32 %v3324_v40, %v2280_v24 }
 0xad5   :  { %v3940_v25 = vpop.f32.mrf.mxu1 }
 0xad6   :  { %3959 = vmatmul.mubr.bf16.vlgmr.msra.gmra.mxu0 %v4633_v19  ;;  %v3410_v45 = vpack.c.bf16 %v2281_v42, %v2281_v42 }
 0xad7   :  { %4022 = vmatprep.mubr.msk.bf16.mxu0 %vm4476_vm0, %v4475_v0  ;;  %v2283_v26 = vpop.f32.mrf.mxu1  ;;  %4007 = vmatpush3.bf16.msra.mxu0 %v4203_v15  ;;  %v4221_v15 = vld [vmem:[#allocation14 + $0x28] sm:$0xff]  }
 0xad8   :  { %v2284_v50 = vadd.f32 %v3324_v40, %v2283_v26  ;;  %4008 = vmatprep.subr.bf16.mxu0 %v4475_v0 }
 0xad9   :  { %v3941_v27 = vpop.f32.mrf.mxu1 }
 0xada   :  { %v3411_v51 = vpack.c.bf16 %v2284_v50, %v2284_v50 }
 0xadb   :  { %4009 = vmatpush3.bf16.msra.mxu0 %v4204_v16  ;;  %v4222_v16 = vld [vmem:[#allocation14 + $0x20] sm:$0xff]  }
 0xadc   :  { %4010 = vmatprep.subr.bf16.mxu0 %v4475_v0 }
 0xadf   :  { %4011 = vmatpush3.bf16.msra.mxu0 %v4205_v17  ;;  %v4223_v17 = vld [vmem:[#allocation14 + $0x18] sm:$0xff]  }
 0xae0   :  { %4012 = vmatprep.subr.bf16.mxu0 %v4475_v0 }
 0xae3   :  { %4013 = vmatpush3.bf16.msra.mxu0 %v4206_v18 }
 0xae4   :  { %4014 = vmatprep.subr.bf16.mxu0 %v4475_v0 }
 0xae7   :  { %4015 = vmatpush3.bf16.msra.mxu0 %v4207_v20 }
 0xae8   :  { %4016 = vmatprep.subr.bf16.mxu0 %v4475_v0 }
 0xaf3   :  { %v2508_v53 = vpop.f32.mrf.mxu1 }
 0xaf4   :  { %v2509_v54 = vadd.f32 %v3344_v52, %v2508_v53 }
 0xaf5   :  { %v3980_v55 = vpop.f32.mrf.mxu1 }
 0xaf6   :  { %v3414_v56 = vpack.c.bf16 %v2509_v54, %v2509_v54  ;;  %v4267_v54 = vld [vmem:[#allocation2] sm:$0xff] }
 0xaf7   :  { %v2511_v57 = vpop.f32.mrf.mxu1 }
 0xaf8   :  { %v2645_v58 = vsel %vm641_vm2, %v3414_v56, 0  ;;  %v2512_v59 = vadd.f32 %v3344_v52, %v2511_v57 }
 0xaf9   :  { %v3981_v60 = vpop.f32.mrf.mxu1 }
 0xafa   :  { %v3415_v24 = vpack.c.bf16 %v2512_v59, %v2512_v59  ;;  %v4211_v60 = vld [vmem:[#allocation13 + $0x38] sm:$0xff]  }
 0xafc   :  { %v2691_v27 = vsel %vm641_vm2, %v3415_v24, 0 }
 0xb76   :  { %v2164_v29 = vpop.f32.mrf.mxu0 }
 0xb77   :  { %v4880_v31 = vadd.f32 %v2164_v29, %v1498_v28 }
 0xb78   :  { %v3920_v33 = vpop.f32.mrf.mxu0 }
 0xb7a   :  { %v2167_v35 = vpop.f32.mrf.mxu0 }
 0xb7b   :  { %v4884_v36 = vadd.f32 %v2167_v35, %v1501_v34  ;;  %v4208_v34 = vld [vmem:[#allocation11 + $0xd0] sm:$0xff]   ;;  %v4209_v35 = vld [vmem:[#allocation11 + $0xc8] sm:$0xff]  }
 0xb7c   :  { %v3921_v19 = vpop.f32.mrf.mxu0  ;;  %4017 = vmatpush3.bf16.msra.mxu0 %v4208_v34  ;;  %v3371_v34 = vld [vmem:[%s4982_s10] ss:$0 sm:$0xff] }
 0xb7d   :  { %4018 = vmatprep.subr.bf16.mxu0 %v4475_v0  ;;  %v4210_v19 = vld [vmem:[#allocation11 + $0xc0] sm:$0xff]  }
 0xb80   :  { %4019 = vmatpush3.bf16.msra.mxu0 %v4209_v35 }
 0xb81   :  { %4020 = vmatprep.subr.bf16.mxu0 %v4475_v0 }
 0xb84   :  { %4021 = vmatpush3.bf16.msra.mxu0 %v4210_v19 }
 0xb85   :  { %4046 = vmatprep.subr.bf16.mxu0 %v4475_v0 }
 0xb96   :  { %v2394_v38 = vpop.f32.mrf.mxu0 }
 0xb97   :  { %v2395_v39 = vadd.f32 %v3334_v37, %v2394_v38 }
 0xb98   :  { %v3960_v41 = vpop.f32.mrf.mxu0 }
 0xb99   :  { %v3412_v30 = vpack.c.bf16 %v2395_v39, %v2395_v39 }
 0xb9a   :  { %v2397_v44 = vpop.f32.mrf.mxu0 }
 0xb9b   :  { %3983 = vmatpush3.bf16.xpose.msra.mxu1 %v3412_v30  ;;  %v2398_v32 = vadd.f32 %v3334_v37, %v2397_v44 }
 0xb9c   :  { %v3961_v46 = vpop.f32.mrf.mxu0  ;;  %3988 = vmatprep.subr.bf16.mxu1 %v4475_v0 }
 0xb9d   :  { %v3413_v49 = vpack.c.bf16 %v2398_v32, %v2398_v32 }
 0xba2   :  { %3985 = vmatmul.mubr.bf16.vlgmr.msra.gmra.mxu1 %v3410_v45  ;;  %v3369_v45 = vld [vmem:[%s4980_s8] ss:$0 sm:$0xff] }
 0xba3   :  { %3989 = vmatpush3.bf16.xpose.msra.mxu1 %v3413_v49  ;;  %3990 = vmatprep.mubr.msk.bf16.mxu1 %vm4476_vm0, %v4475_v0 }
 0xba4   :  { %3994 = vmatprep.subr.bf16.mxu1 %v4475_v0 }
 0xbaa   :  { %3991 = vmatmul.mubr.bf16.vlgmr.msra.gmra.mxu1 %v3411_v51 }
 0xbab   :  { %3996 = vmatprep.mubr.msk.bf16.mxu1 %vm4476_vm0, %v4475_v0  ;;  %3995 = vmatpush3.bf16.msra.mxu1 %v2645_v58  ;;  %v4268_v58 = vld [vmem:[#allocation2 + $0x8] sm:$0xff] }
 0xbac   :  { %4000 = vmatprep.subr.bf16.mxu1 %v4475_v0 }
 0xc62   :  { %v2571_v61 = vpop.f32.mrf.mxu1 }
 0xc63   :  { %v2617_v62 = vsel %vm613_vm1, %v2571_v61, -inf }
 0xc64   :  { %2618 = vmax.xlane.f32.xlu0 %v2617_v62  ;;  %v3986_v63 = vpop.f32.mrf.mxu1 }
 0xc66   :  { %v2574_v1 = vpop.f32.mrf.mxu1 }
 0xc68   :  { %v3987_v2 = vpop.f32.mrf.mxu1 }
 0xc6a   :  { %v2611_v3 = vpop.f32.mrf.mxu1 }
 0xc6b   :  { %v2620_v4 = vsel %vm613_vm1, %v2611_v3, -inf }
 0xc6c   :  { %2621 = vmax.xlane.f32.xlu1 %v2620_v4  ;;  %v3992_v5 = vpop.f32.mrf.mxu1 }
 0xc6e   :  { %v2614_v6 = vpop.f32.mrf.mxu1 }
 0xc70   :  { %v3993_v7 = vpop.f32.mrf.mxu1 }
 0xced   :  { %v2619_v8 = vpop.xlane.xlu0 %2618 }
 0xcee   :  { %v2623_v9 = vsub.f32 %v2571_v61, %v2619_v8  ;;  %v170_v61 = vlaneseq }
 0xcf0   :  { %v2625_v43 = vmul.f32 1.442695, %v2623_v9  ;;  %v171_v62 = vand.u32 127, %v170_v61  ;;  %v4212_v9 = vld [vmem:[#allocation13 + $0x30] sm:$0xff]  }
 0xcf2   :  { %4251 = vpow2.f32 %v2625_v43  ;;  %vm172_vm3 = vcmp.lt.s32.totalorder %v171_v62, 32  ;;  %v4213_v43 = vld [vmem:[#allocation13 + $0x28] sm:$0xff]  }
 0xcf3   :  { %v4929_v1 = vsel %vm172_vm3, 1.0, %v4475_v0 }
 0xcf5   :  { %v2622_v47 = vpop.xlane.xlu1 %2621 }
 0xcf6   :  { %v2624_v48 = vsub.f32 %v2611_v3, %v2622_v47  ;;  %v4214_v47 = vld [vmem:[#allocation13 + $0x20] sm:$0xff]  }
 0xcf8   :  { %v2627_v10 = vmul.f32 1.442695, %v2624_v48  ;;  %v4215_v48 = vld [vmem:[#allocation13 + $0x18] sm:$0xff]  }
 0xcfa   :  { %4253 = vpow2.f32 %v2627_v10  ;;  %v4216_v10 = vld [vmem:[#allocation13 + $0x10] sm:$0xff]  }
 0xcff   :  { %v4252_v11 = vpop.eup %4251 }
 0xd00   :  { %v2629_v12 = vsel %vm613_vm1, %v4252_v11, 0.0 }
 0xd01   :  { %2630 = vadd.xlane.f32.xlu0 %v2629_v12  ;;  %v4218_v12 = vld [vmem:[#allocation13] sm:$0xff]  }
 0xd07   :  { %v4254_v13 = vpop.eup %4253 }
 0xd08   :  { %v2632_v14 = vsel %vm613_vm1, %v4254_v13, 0.0 }
 0xd09   :  { %2633 = vadd.xlane.f32.xlu1 %v2632_v14  ;;  %v4220_v14 = vld [vmem:[#allocation14 + $0x30] sm:$0xff]  }
 0xd8a   :  { %v2631_v21 = vpop.xlane.xlu0 %2630 }
 0xd8b   :  { %4255 = vrcp.f32 %v2631_v21 }
 0xd92   :  { %v2634_v22 = vpop.xlane.xlu1 %2633 }
 0xd93   :  { %4257 = vrcp.f32 %v2634_v22 }
 0xd98   :  { %v4256_v23 = vpop.eup %4255 }
 0xd99   :  { %v2637_v25 = vmul.f32 %v4256_v23, %v4252_v11  ;;  %v4217_v11 = vld [vmem:[#allocation13 + $0x8] sm:$0xff]  }
 0xd9b   :  { %v2639_v26 = vpack.c.bf16 %v2637_v25, %v2637_v25 }
 0xd9d   :  { %3997 = vmatmul.mubr.msk.bf16.vlgmr.msra.gmra.mxu1 %vm613_vm1, %v2639_v26 }
 0xd9e   :  { %4001 = vmatpush3.bf16.msra.mxu1 %v2691_v27  ;;  %4002 = vmatprep.mubr.msk.bf16.mxu1 %vm4476_vm0, %v4475_v0  ;;  %v3370_v27 = vld [vmem:[%s4981_s9] ss:$0 sm:$0xff] }
 0xd9f   :  { %4026 = vmatprep.subr.bf16.mxu1 %v4475_v0 }
 0xda0   :  { %v4258_v28 = vpop.eup %4257 }
 0xda1   :  { %v2638_v29 = vmul.f32 %v4258_v28, %v4254_v13  ;;  %v4219_v13 = vld [vmem:[#allocation14 + $0x38] sm:$0xff]  }
 0xda3   :  { %v2640_v33 = vpack.c.bf16 %v2638_v29, %v2638_v29 }
 0xda5   :  { %4003 = vmatmul.mubr.msk.bf16.vlgmr.msra.gmra.mxu1 %vm613_vm1, %v2640_v33 }
 0xda6   :  { %4042 = vmatprep.mubr.msk.bf16.mxu1 %vm4476_vm0, %v4475_v0  ;;  %4027 = vmatpush3.bf16.msra.mxu1 %v4211_v60 }
 0xda7   :  { %4028 = vmatprep.subr.bf16.mxu1 %v4475_v0 }
 0xdaa   :  { %4029 = vmatpush3.bf16.msra.mxu1 %v4212_v9 }
 0xdab   :  { %4030 = vmatprep.subr.bf16.mxu1 %v4475_v0 }
 0xdae   :  { %4031 = vmatpush3.bf16.msra.mxu1 %v4213_v43 }
 0xdaf   :  { %4032 = vmatprep.subr.bf16.mxu1 %v4475_v0 }
 0xdb2   :  { %4033 = vmatpush3.bf16.msra.mxu1 %v4214_v47 }
 0xdb3   :  { %4034 = vmatprep.subr.bf16.mxu1 %v4475_v0 }
 0xdb6   :  { %4035 = vmatpush3.bf16.msra.mxu1 %v4215_v48 }
 0xdb7   :  { %4036 = vmatprep.subr.bf16.mxu1 %v4475_v0 }
 0xdba   :  { %4037 = vmatpush3.bf16.msra.mxu1 %v4216_v10 }
 0xdbb   :  { %4038 = vmatprep.subr.bf16.mxu1 %v4475_v0 }
 0xdbe   :  { %4039 = vmatpush3.bf16.msra.mxu1 %v4217_v11  ;;  %v3390_v11 = vld [vmem:[%s4987_s15] ss:$0 sm:$0xff] }
 0xdbf   :  { %4040 = vmatprep.subr.bf16.mxu1 %v4475_v0 }
 0xdc2   :  { %4041 = vmatpush3.bf16.msra.mxu1 %v4218_v12 }
 0xe5d   :  { %v2681_v37 = vpop.f32.mrf.mxu1 }
 0xe5f   :  { %v3998_v38 = vpop.f32.mrf.mxu1 }
 0xe61   :  { %v2684_v39 = vpop.f32.mrf.mxu1 }
 0xe62   :  { %v4224_v39 = vld [vmem:[#allocation14 + $0x10] sm:$0xff]  }
 0xe63   :  { %v3999_v40 = vpop.f32.mrf.mxu1 }
 0xe64   :  { %v4225_v40 = vld [vmem:[#allocation14 + $0x8] sm:$0xff]  }
 0xe65   :  { %v2727_v41 = vpop.f32.mrf.mxu1 }
 0xe66   :  { %v2733_v30 = vpack.c.bf16 %v2727_v41, %v2681_v37  ;;  %v4226_v41 = vld [vmem:[#allocation14] sm:$0xff]  }
 0xe67   :  { %v4004_v42 = vpop.f32.mrf.mxu1 }
 0xe68   :  { %4023 = vmatmul.mubr.bf16.vlgmr.msra.gmra.mxu0 %v2733_v30  ;;  %v3372_v30 = vld [vmem:[%s4984_s12] ss:$0 sm:$0xff] }
 0xe69   :  { %v2730_v44 = vpop.f32.mrf.mxu1  ;;  %4062 = vmatprep.mubr.msk.bf16.mxu0 %vm4476_vm0, %v4475_v0  ;;  %4047 = vmatpush3.bf16.msra.mxu0 %v4219_v13 }
 0xe6a   :  { %4048 = vmatprep.subr.bf16.mxu0 %v4475_v0 }
 0xe6b   :  { %v4005_v46 = vpop.f32.mrf.mxu1 }
 0xe6d   :  { %4049 = vmatpush3.bf16.msra.mxu0 %v4220_v14 }
 0xe6e   :  { %4050 = vmatprep.subr.bf16.mxu0 %v4475_v0 }
 0xe71   :  { %4051 = vmatpush3.bf16.msra.mxu0 %v4221_v15 }
 0xe72   :  { %4052 = vmatprep.subr.bf16.mxu0 %v4475_v0 }
 0xe75   :  { %4053 = vmatpush3.bf16.msra.mxu0 %v4222_v16 }
 0xe76   :  { %4054 = vmatprep.subr.bf16.mxu0 %v4475_v0 }
 0xe79   :  { %4055 = vmatpush3.bf16.msra.mxu0 %v4223_v17 }
 0xe7a   :  { %4056 = vmatprep.subr.bf16.mxu0 %v4475_v0 }
 0xe7d   :  { %4057 = vmatpush3.bf16.msra.mxu0 %v4224_v39 }
 0xe7e   :  { %4058 = vmatprep.subr.bf16.mxu0 %v4475_v0 }
 0xe81   :  { %4059 = vmatpush3.bf16.msra.mxu0 %v4225_v40 }
 0xe82   :  { %4060 = vmatprep.subr.bf16.mxu0 %v4475_v0  ;;  %v3381_v0 = vld [vmem:[%s4986_s14] ss:$0 sm:$0xff] }
 0xe85   :  { %4061 = vmatpush3.bf16.msra.mxu0 %v4226_v41 }
 0xf28   :  { %v2833_v32 = vpop.f32.mrf.mxu0 }
 0xf29   :  { %v2840_v49 = vadd.f32 %v2833_v32, %v4880_v31 }
 0xf2a   :  { %v4024_v50 = vpop.f32.mrf.mxu0 }
 0xf2b   :  { %v2849_v51 = vadd.f32 %v3369_v45, %v2840_v49 }
 0xf2c   :  { %v2836_v52 = vpop.f32.mrf.mxu0 }
 0xf2d   :  { %v2841_v53 = vadd.f32 %v2836_v52, %v4884_v36  ;;  %v2851_v55 = vadd.f32 %v4267_v54, %v2849_v51 }
 0xf2e   :  { %v4025_v56 = vpop.f32.mrf.mxu0 }
 0xf2f   :  { %v2850_v57 = vadd.f32 %v3369_v45, %v2841_v53  ;;  %2855 = vadd.xlane.f32.xlu0 %v2851_v55 }
 0xf31   :  { %v2852_v59 = vadd.f32 %v4268_v58, %v2850_v57 }
 0xf33   :  { %2857 = vadd.xlane.f32.xlu1 %v2852_v59 }
 0xfb8   :  { %v2856_v31 = vpop.xlane.xlu0 %2855 }
 0xfb9   :  { %v2859_v63 = vmul.f32 0.03125, %v2856_v31 }
 0xfbb   :  { %v2861_v36 = vsub.f32 %v2851_v55, %v2859_v63 }
 0xfbc   :  { %v2858_v2 = vpop.xlane.xlu1 %2857 }
 0xfbd   :  { %v2860_v3 = vmul.f32 0.03125, %v2858_v2  ;;  %v2863_v4 = vmul.f32 %v4929_v1, %v2861_v36 }
 0xfbf   :  { %v2862_v5 = vsub.f32 %v2852_v59, %v2860_v3  ;;  %v2865_v6 = vmul.f32 %v2863_v4, %v2863_v4 }
 0xfc1   :  { %2867 = vadd.xlane.f32.xlu0 %v2865_v6  ;;  %v2864_v7 = vmul.f32 %v4929_v1, %v2862_v5 }
 0xfc3   :  { %v2866_v8 = vmul.f32 %v2864_v7, %v2864_v7 }
 0xfc5   :  { %2869 = vadd.xlane.f32.xlu1 %v2866_v8 }
0x104a   :  { %v2868_v18 = vpop.xlane.xlu0 %2867 }
0x104b   :  { %v2871_v20 = vmul.f32 0.03125, %v2868_v18 }
0x104d   :  { %v2873_v21 = vadd.f32 1e-05, %v2871_v20 }
0x104e   :  { %v2870_v22 = vpop.xlane.xlu1 %2869 }
0x104f   :  { %4259 = vrsqrt.f32 %v2873_v21  ;;  %v2872_v23 = vmul.f32 0.03125, %v2870_v22 }
0x1051   :  { %v2874_v24 = vadd.f32 1e-05, %v2872_v23 }
0x1053   :  { %4261 = vrsqrt.f32 %v2874_v24 }
0x105c   :  { %v4260_v25 = vpop.eup %4259 }
0x105d   :  { %v2877_v26 = vmul.f32 %v4260_v25, %v2863_v4 }
0x105f   :  { %v2885_v33 = vmul.f32 %v3370_v27, %v2877_v26 }
0x1060   :  { %v4262_v28 = vpop.eup %4261 }
0x1061   :  { %v2878_v29 = vmul.f32 %v4262_v28, %v2864_v7  ;;  %v2893_v19 = vadd.f32 %v3371_v34, %v2885_v33 }
0x1063   :  { %v2886_v35 = vmul.f32 %v3370_v27, %v2878_v29 }
0x1065   :  { %v2894_v37 = vadd.f32 %v3371_v34, %v2886_v35 }
0x1067   :  { %v2895_v38 = vpack.c.bf16 %v2894_v37, %v2893_v19 }
0x1069   :  { %4043 = vmatmul.mubr.bf16.vlgmr.msra.gmra.mxu1 %v2895_v38 }
0x1129   :  { %v3001_v42 = vpop.f32.mrf.mxu1 }
0x112a   :  { %v3002_v46 = vadd.f32 %v3372_v30, %v3001_v42 }
0x112b   :  { %v4044_v44 = vpop.f32.mrf.mxu1 }
0x112c   :  { %v3008_v50 = vmax.f32 %v3002_v46, 0.0 }
0x112d   :  { %v3004_v32 = vpop.f32.mrf.mxu1 }
0x112e   :  { %v3005_v45 = vadd.f32 %v3372_v30, %v3004_v32 }
0x112f   :  { %v4045_v49 = vpop.f32.mrf.mxu1 }
0x1130   :  { %v3009_v51 = vmax.f32 %v3005_v45, 0.0 }
0x1132   :  { %v3010_v52 = vpack.c.bf16 %v3009_v51, %v3008_v50 }
0x1134   :  { %4063 = vmatmul.mubr.bf16.vlgmr.msra.gmra.mxu0 %v3010_v52 }
0x11f4   :  { %v3116_v53 = vpop.f32.mrf.mxu0 }
0x11f5   :  { %v3117_v54 = vadd.f32 %v3381_v0, %v3116_v53 }
0x11f6   :  { %v4064_v55 = vpop.f32.mrf.mxu0 }
0x11f7   :  { %v3123_v56 = vadd.f32 %v3117_v54, %v2893_v19 }
0x11f8   :  { %v3119_v57 = vpop.f32.mrf.mxu0 }
0x11f9   :  { %v3120_v58 = vadd.f32 %v3381_v0, %v3119_v57  ;;  %3127 = vadd.xlane.f32.xlu0 %v3123_v56 }
0x11fa   :  { %v4065_v59 = vpop.f32.mrf.mxu0 }
0x11fb   :  { %v3124_v60 = vadd.f32 %v3120_v58, %v2894_v37 }
0x11fd   :  { %3129 = vadd.xlane.f32.xlu1 %v3124_v60 }
0x1282   :  { %v3128_v61 = vpop.xlane.xlu0 %3127 }
0x1283   :  { %v3131_v62 = vmul.f32 0.03125, %v3128_v61 }
0x1285   :  { %v3133_v31 = vsub.f32 %v3123_v56, %v3131_v62 }
0x1286   :  { %v3130_v63 = vpop.xlane.xlu1 %3129 }
0x1287   :  { %v3132_v36 = vmul.f32 0.03125, %v3130_v63  ;;  %v3135_v2 = vmul.f32 %v4929_v1, %v3133_v31 }
0x1289   :  { %v3134_v3 = vsub.f32 %v3124_v60, %v3132_v36  ;;  %v3137_v4 = vmul.f32 %v3135_v2, %v3135_v2 }
0x128b   :  { %3139 = vadd.xlane.f32.xlu0 %v3137_v4  ;;  %v3136_v5 = vmul.f32 %v4929_v1, %v3134_v3  ;;  %v3391_v1 = vld [vmem:[%s4988_s16] ss:$0 sm:$0xff] }
0x128d   :  { %v3138_v6 = vmul.f32 %v3136_v5, %v3136_v5 }
0x128f   :  { %3141 = vadd.xlane.f32.xlu1 %v3138_v6 }
0x1314   :  { %v3140_v7 = vpop.xlane.xlu0 %3139 }
0x1315   :  { %v3143_v8 = vmul.f32 0.03125, %v3140_v7 }
0x1317   :  { %v3145_v9 = vadd.f32 1e-05, %v3143_v8 }
0x1318   :  { %v3142_v43 = vpop.xlane.xlu1 %3141 }
0x1319   :  { %4263 = vrsqrt.f32 %v3145_v9  ;;  %v3144_v47 = vmul.f32 0.03125, %v3142_v43 }
0x131b   :  { %v3146_v48 = vadd.f32 1e-05, %v3144_v47 }
0x131d   :  { %4265 = vrsqrt.f32 %v3146_v48 }
0x1326   :  { %v4264_v10 = vpop.eup %4263 }
0x1327   :  { %v3149_v12 = vmul.f32 %v4264_v10, %v3135_v2 }
0x1329   :  { %v3157_v13 = vmul.f32 %v3390_v11, %v3149_v12 }
0x132a   :  { %v4266_v14 = vpop.eup %4265 }
0x132b   :  { %v3150_v15 = vmul.f32 %v4266_v14, %v3136_v5  ;;  %v3165_v16 = vadd.f32 %v3391_v1, %v3157_v13 }
0x132d   :  { %v3158_v17 = vmul.f32 %v3390_v11, %v3150_v15  ;;  %3167 = vst [vmem:[#allocation16] sm:$0xff] %v3165_v16 }
0x132f   :  { %v3166_v18 = vadd.f32 %v3391_v1, %v3158_v17 }
0x1331   :  { %3168 = vst [vmem:[#allocation16 + $0x8] sm:$0xff] %v3166_v18 }
0x1332   :  { %4440 = shalt.err (!%p4437_p2)
}
0x1333   :  { %3180 = dma.vmem_to_hbm [thread:$0]  %s3175_s30, 256, %s4989_s17, [#allocation4], %s4467_s3, %s4467_s3, %s4468_s18  }
0x1334   :  { %4459 = dma.done.wait [#allocation4], 256  }
0x1335   :  { %4460 = vsyncadd [#allocation4], 4294967040 }
0x1336   :  { %3184 = vsyncpa [#allocation3], 1 }
0x1337   :  { %3185 = vsyncpa [#allocation6], 1 }
0x1338   :  { %3186 = vsyncpa [#allocation9], 1 }
0x1339   :  { %3187 = vsyncpa [#allocation12], 1 }
0x133a   :  { %3188 = vsyncpa [#allocation15], 1 }
0x133b   :  { %3189 = vsyncpa [#allocation4], 1 }

</bundles_post_ra>
